<compile_context>
chip_gen: v5e
topology: v5e:2x2
jax: 0.10.0
libtpu: 0.0.40
codegen_flags: <defaults>
</compile_context>

<pallas_src>
import jax
import jax.numpy as jnp
from jax.experimental import pallas as pl
from jax.experimental.pallas import tpu as pltpu


# ------------------------------ helpers -------------------------------------

def _round_up(x, m):
    return (x + m - 1) // m * m


def _physical_vmem_bytes():
    """Per-core VMEM capacity; conservative fallback if the query is unavailable."""
    try:
        cap = getattr(pltpu.get_tpu_info(), "vmem_capacity_bytes", None)
        if cap:
            return int(cap)
    except Exception:
        pass
    return 64 * 1024 * 1024          # v7x-sized fallback (safe lower bound everywhere)


def _pick_tiles(n_pad):
    """(tm, tk): row tile (parallel axis) and A-column tile (reduction axis)."""
    def pick(cands):
        for t in cands:
            if n_pad % t == 0:
                return t
        return 128
    tm = pick((512, 256, 128))                 # keeps >=2 row blocks on real graphs (megacore)
    tk = pick((2048, 1024, 512, 256, 128))     # large K tile: fewer ~0.35us grid steps
    return tm, tk


# Streaming-path buffers peak at ~6 MiB for (tm, tk) = (512, 2048); 32 MiB is a
# safe explicit limit on v5e (16 MiB default), v6e and v7x (64 MiB physical).
_STREAM_VMEM_LIMIT = 32 * 1024 * 1024


def glorot(key, shape):
    fan_in, fan_out = shape[0], shape[1]
    limit = jnp.sqrt(6.0 / (fan_in + fan_out))
    return jax.random.uniform(key, shape, jnp.float32, -limit, limit)


# --------------------------- Pallas kernels ---------------------------------

def _layer1_kernel(a_ref, xw1_ref, b1_ref, w2r_ref, g_ref, acc_ref):
    """g = relu(A_norm @ XW1 + b1) @ w2, row-tiled with a K reduction over A cols.

    X@W1 is hoisted to the wrapper (lane-dense bf16 operand) and the H->1
    projection is fused into the epilogue, so h never touches HBM.
    """
    k = pl.program_id(1)

    @pl.when(k == 0)
    def _():
        acc_ref[...] = jnp.zeros_like(acc_ref)

    acc_ref[...] += jnp.dot(a_ref[...], xw1_ref[...],
                            preferred_element_type=jnp.float32)

    @pl.when(k == pl.num_programs(1) - 1)
    def _():
        h = jnp.maximum(acc_ref[...] + b1_ref[...], 0.0)            # (tm, Hp) f32
        g = jnp.sum(h * w2r_ref[...], axis=-1, keepdims=True)       # (tm, 1)  f32
        g_ref[...] = g.astype(g_ref.dtype)


def _layer2_kernel(a_ref, g_ref, b2_ref, o_ref, acc_ref):
    """out = A_norm @ g + b2 as a bf16 MXU matvec; streams the SAME A (no A^T)."""
    k = pl.program_id(1)

    @pl.when(k == 0)
    def _():
        acc_ref[...] = jnp.zeros_like(acc_ref)

    g = g_ref[...].astype(jnp.bfloat16)                              # (tk, 1)
    acc_ref[...] += jnp.dot(a_ref[...], g,
                            preferred_element_type=jnp.float32)      # (tm, tk) @ (tk, 1)

    @pl.when(k == pl.num_programs(1) - 1)
    def _():
        o_ref[...] = acc_ref[...] + b2_ref[0, 0]


def _fused_kernel(a_ref, xw1_ref, b1_ref, w2r_ref, b2_ref, o_ref):
    """A-resident fused path: both aggregations with a single read of A."""
    h = jnp.maximum(
        jnp.dot(a_ref[...], xw1_ref[...], preferred_element_type=jnp.float32)
        + b1_ref[...], 0.0)
    g = jnp.sum(h * w2r_ref[...], axis=-1, keepdims=True).astype(jnp.bfloat16)
    o_ref[...] = jnp.dot(a_ref[...], g,
                         preferred_element_type=jnp.float32) + b2_ref[0, 0]


# --------------------------- pallas_call wrappers ----------------------------

def gcn_layer1(a_bf, xw1, b1, w2r, *, tm, tk):
    n_pad = a_bf.shape[0]
    hp = xw1.shape[1]
    grid = (n_pad // tm, n_pad // tk)
    return pl.pallas_call(
        _layer1_kernel,
        out_shape=jax.ShapeDtypeStruct((n_pad, 1), jnp.float32),
        grid_spec=pltpu.PrefetchScalarGridSpec(
            num_scalar_prefetch=0,
            grid=grid,
            in_specs=[
                pl.BlockSpec((tm, tk), lambda i, k: (i, k)),    # A_norm (bf16)
                pl.BlockSpec((tk, hp), lambda i, k: (k, 0)),    # XW1 rows for K block
                pl.BlockSpec((1, hp), lambda i, k: (0, 0)),     # b1
                pl.BlockSpec((1, hp), lambda i, k: (0, 0)),     # w2 as a row
            ],
            out_specs=pl.BlockSpec((tm, 1), lambda i, k: (i, 0)),
            scratch_shapes=[pltpu.VMEM((tm, hp), jnp.float32)],
        ),
        compiler_params=pltpu.CompilerParams(
            dimension_semantics=("parallel", "arbitrary"),
            vmem_limit_bytes=_STREAM_VMEM_LIMIT,
        ),
    )(a_bf, xw1, b1, w2r)


def gcn_layer2(a_bf, g, b2, *, tm, tk):
    n_pad = a_bf.shape[0]
    grid = (n_pad // tm, n_pad // tk)
    return pl.pallas_call(
        _layer2_kernel,
        out_shape=jax.ShapeDtypeStruct((n_pad, 1), jnp.float32),
        grid_spec=pltpu.PrefetchScalarGridSpec(
            num_scalar_prefetch=0,
            grid=grid,
            in_specs=[
                pl.BlockSpec((tm, tk), lambda i, k: (i, k)),          # same A (no A^T)
                pl.BlockSpec((tk, 1), lambda i, k: (k, 0)),           # g column
                pl.BlockSpec(memory_space=pltpu.MemorySpace.SMEM),    # b2 scalar
            ],
            out_specs=pl.BlockSpec((tm, 1), lambda i, k: (i, 0)),
            scratch_shapes=[pltpu.VMEM((tm, 1), jnp.float32)],
        ),
        compiler_params=pltpu.CompilerParams(
            dimension_semantics=("parallel", "arbitrary"),
            vmem_limit_bytes=_STREAM_VMEM_LIMIT,
        ),
    )(a_bf, g, b2)


def gcn_fused(a_bf, xw1, b1, w2r, b2, *, vmem_limit):
    n_pad, hp = xw1.shape
    return pl.pallas_call(
        _fused_kernel,
        out_shape=jax.ShapeDtypeStruct((n_pad, 1), jnp.float32),
        grid_spec=pltpu.PrefetchScalarGridSpec(
            num_scalar_prefetch=0,
            grid=(1,),
            in_specs=[
                pl.BlockSpec((n_pad, n_pad), lambda i: (0, 0)),       # A resident in VMEM
                pl.BlockSpec((n_pad, hp), lambda i: (0, 0)),
                pl.BlockSpec((1, hp), lambda i: (0, 0)),
                pl.BlockSpec((1, hp), lambda i: (0, 0)),
                pl.BlockSpec(memory_space=pltpu.MemorySpace.SMEM),    # b2 scalar
            ],
            out_specs=pl.BlockSpec((n_pad, 1), lambda i: (0, 0)),
        ),
        compiler_params=pltpu.CompilerParams(
            dimension_semantics=("arbitrary",),
            vmem_limit_bytes=vmem_limit,
        ),
    )(a_bf, xw1, b1, w2r, b2)


# ------------------------------- JAX glue ------------------------------------

def build_normalized_adjacency(edge_index, edge_weight, num_nodes, n_pad):
    """Dense D^{-1/2}(A + I)D^{-1/2}, padded to n_pad with zero rows/cols, bf16.

    Matches PyG gcn_norm: rows = target, cols = source; duplicate edges are
    scatter-added; self-loops (weight 1) are added only for nodes without one.
    The scale + bf16 cast fuse into a single elementwise pass; no transpose.
    """
    src = edge_index[0]
    tgt = edge_index[1]
    if edge_weight is None:
        edge_weight = jnp.ones(src.shape, jnp.float32)
    adj = jnp.zeros((n_pad, n_pad), jnp.float32)
    adj = adj.at[tgt, src].add(edge_weight.astype(jnp.float32))

    idx = jnp.arange(n_pad)
    diag_vals = adj[idx, idx]
    is_real = idx < num_nodes
    new_diag = jnp.where(is_real & (diag_vals == 0.0), 1.0, diag_vals)
    adj = adj.at[idx, idx].set(new_diag)

    deg = jnp.sum(adj, axis=1)                      # weighted in-degree per target
    dinv = jnp.where(deg > 0, jax.lax.rsqrt(deg), 0.0)
    return (dinv[:, None] * adj * dinv[None, :]).astype(jnp.bfloat16)


class AggregationNetworkPallas:
    """Parameter container + forward wrapper (inference mode)."""

    def __init__(self, num_node_feature, hidden_dim, key, dropout=0.2, adj_dropout=0.2):
        k1, k2 = jax.random.split(key)
        hp = _round_up(hidden_dim, 128)       # lane-pad hidden dim (free MXU width)
        w1 = jnp.zeros((num_node_feature, hp), jnp.float32)
        w1 = w1.at[:, :hidden_dim].set(glorot(k1, (num_node_feature, hidden_dim)))
        self.w1 = w1.astype(jnp.bfloat16)     # padded columns stay exactly zero
        self.b1 = jnp.zeros((1, hp), jnp.float32)
        w2 = glorot(k2, (hidden_dim, 1))
        self.w2r = jnp.zeros((1, hp), jnp.float32).at[0, :hidden_dim].set(w2[:, 0])
        self.b2 = jnp.zeros((1, 1), jnp.float32)
        self.hidden_dim = hidden_dim
        self.hidden_pad = hp
        self.dropout = dropout                # training-only; identity at inference
        self.adj_dropout = adj_dropout        # training-only; identity at inference

    def __call__(self, x, edge_index, edge_weight, *, force_streaming=False):
        n = x.shape[0]
        n_pad = _round_up(max(n, 1), 128)
        hp = self.hidden_pad

        a_bf = build_normalized_adjacency(edge_index, edge_weight, n, n_pad)  # bf16 [n_pad, n_pad]

        # Hoisted X @ W1: lane-dense bf16 [n_pad, Hp] operand for the kernels.
        x_pad = jnp.zeros((n_pad, x.shape[1]), jnp.bfloat16).at[:n].set(x.astype(jnp.bfloat16))
        xw1 = jnp.dot(x_pad, self.w1, preferred_element_type=jnp.float32).astype(jnp.bfloat16)

        # A-resident fused path when the (double-buffered) operands fit VMEM.
        phys = _physical_vmem_bytes()
        a_bytes = n_pad * n_pad * 2
        fused_need = 2 * a_bytes + 2 * n_pad * hp * 2 + n_pad * hp * 4 + (1 << 20)
        if (not force_streaming) and fused_need <= int(phys * 0.7):
            vmem_limit = max(_STREAM_VMEM_LIMIT,
                             min(int(phys * 0.85), fused_need + (8 << 20)))
            out_col = gcn_fused(a_bf, xw1, self.b1, self.w2r, self.b2,
                                vmem_limit=vmem_limit)
        else:
            tm, tk = _pick_tiles(n_pad)
            g = gcn_layer1(a_bf, xw1, self.b1, self.w2r, tm=tm, tk=tk)   # [n_pad, 1] f32
            out_col = gcn_layer2(a_bf, g, self.b2, tm=tm, tk=tk)         # [n_pad, 1] f32
        return out_col[:n]


# --------------------------------- demo --------------------------------------

if __name__ == "__main__":
    key = jax.random.PRNGKey(0)
    k_x, k_e, k_w, k_p = jax.random.split(key, 4)

    num_nodes = 300
    num_node_feature = 8
    hidden_dim = 32
    num_edges = 900

    x = jax.random.normal(k_x, (num_nodes, num_node_feature), jnp.float32)
    edge_index = jax.random.randint(k_e, (2, num_edges), 0, num_nodes, jnp.int32)
    edge_weight = jax.random.uniform(k_w, (num_edges,), jnp.float32, 0.5, 1.5)

    model = AggregationNetworkPallas(num_node_feature, hidden_dim, k_p)

    out_fused = model(x, edge_index, edge_weight)                         # A-resident path
    out_stream = model(x, edge_index, edge_weight, force_streaming=True)  # tiled 2-pass path
    jax.block_until_ready((out_fused, out_stream))

    assert out_fused.shape == (num_nodes, 1) and out_fused.dtype == jnp.float32
    assert out_stream.shape == (num_nodes, 1) and out_stream.dtype == jnp.float32

    # Precision-matched plain-JAX reference (same bf16-rounded operands).
    n_pad = _round_up(num_nodes, 128)
    a_f = build_normalized_adjacency(edge_index, edge_weight, num_nodes,
                                     n_pad).astype(jnp.float32)
    x_pad = jnp.zeros((n_pad, num_node_feature), jnp.bfloat16).at[:num_nodes].set(
        x.astype(jnp.bfloat16))
    xw1_f = jnp.dot(x_pad, model.w1, preferred_element_type=jnp.float32
                    ).astype(jnp.bfloat16).astype(jnp.float32)
    h_ref = jnp.maximum(a_f @ xw1_f + model.b1, 0.0)
    g_ref = jnp.sum(h_ref * model.w2r, axis=-1, keepdims=True
                    ).astype(jnp.bfloat16).astype(jnp.float32)
    out_ref = (a_f @ g_ref + model.b2[0, 0])[:num_nodes]

    for name, o in (("fused", out_fused), ("stream", out_stream)):
        err = float(jnp.max(jnp.abs(o - out_ref)))
        assert jnp.allclose(o, out_ref, atol=1e-2, rtol=1e-2), (name, err)

    print("KERNEL_OK")
</pallas_src>

<mosaic_0001>
module attributes {stable_mosaic.version = 11 : i64} {
  func.func @_fused_kernel(%arg0: i32, %arg1: memref<384x384xbf16, #tpu.memory_space<vmem>>, %arg2: memref<384x128xbf16, #tpu.memory_space<vmem>>, %arg3: memref<1x128xf32, #tpu.memory_space<vmem>>, %arg4: memref<1x128xf32, #tpu.memory_space<vmem>>, %arg5: memref<1x1xf32, #tpu.memory_space<smem>>, %arg6: memref<384x1xf32, #tpu.memory_space<vmem>>) attributes {dimension_semantics = [#tpu.dimension_semantics<arbitrary>], iteration_bounds = array<i64: 1>, scalar_prefetch = 0 : i64, scratch_operands = 0 : i64, tpu.core_type = #tpu.core_type<tc>, window_params = [{pipeline_mode = #tpu.pipeline_mode<synchronous>, transform_indices = @transform_0, window_bounds = array<i64: 384, 384>}, {pipeline_mode = #tpu.pipeline_mode<synchronous>, transform_indices = @transform_1, window_bounds = array<i64: 384, 128>}, {pipeline_mode = #tpu.pipeline_mode<synchronous>, transform_indices = @transform_2, window_bounds = array<i64: 1, 128>}, {pipeline_mode = #tpu.pipeline_mode<synchronous>, transform_indices = @transform_3, window_bounds = array<i64: 1, 128>}, {transform_indices = @transform_4, window_bounds = array<i64: 1, 1>}, {pipeline_mode = #tpu.pipeline_mode<synchronous>, transform_indices = @transform_5, window_bounds = array<i64: 384, 1>}]} {
    %c0 = arith.constant 0 : index
    %c0_0 = arith.constant 0 : index
    %0 = vector.load %arg1[%c0, %c0_0] : memref<384x384xbf16, #tpu.memory_space<vmem>>, vector<384x384xbf16>
    %c0_1 = arith.constant 0 : index
    %c0_2 = arith.constant 0 : index
    %1 = vector.load %arg2[%c0_1, %c0_2] : memref<384x128xbf16, #tpu.memory_space<vmem>>, vector<384x128xbf16>
    %cst = arith.constant dense<0.000000e+00> : vector<384x128xf32>
    %2 = tpu.matmul %0, %1, %cst {dimension_numbers = #tpu.dot_dimension_numbers<[1], [0], [0], [1], [0, 0, 1, 1], [], []>} : vector<384x384xbf16>, vector<384x128xbf16>, vector<384x128xf32> -> vector<384x128xf32>
    %c0_3 = arith.constant 0 : index
    %c0_4 = arith.constant 0 : index
    %3 = vector.load %arg3[%c0_3, %c0_4] : memref<1x128xf32, #tpu.memory_space<vmem>>, vector<1x128xf32>
    %4 = vector.broadcast %3 : vector<1x128xf32> to vector<384x128xf32>
    %5 = arith.addf %2, %4 : vector<384x128xf32>
    %cst_5 = arith.constant 0.000000e+00 : f32
    %6 = vector.broadcast %cst_5 : f32 to vector<384x128xf32>
    %7 = arith.maximumf %5, %6 : vector<384x128xf32>
    %c0_6 = arith.constant 0 : index
    %c0_7 = arith.constant 0 : index
    %8 = vector.load %arg4[%c0_6, %c0_7] : memref<1x128xf32, #tpu.memory_space<vmem>>, vector<1x128xf32>
    %9 = vector.broadcast %8 : vector<1x128xf32> to vector<384x128xf32>
    %10 = arith.mulf %7, %9 : vector<384x128xf32>
    %cst_8 = arith.constant dense<0.000000e+00> : vector<384xf32>
    %11 = vector.multi_reduction <add>, %10, %cst_8 [1] : vector<384x128xf32> to vector<384xf32>
    %12 = vector.shape_cast %11 : vector<384xf32> to vector<384x1xf32>
    %13 = arith.truncf %12 : vector<384x1xf32> to vector<384x1xbf16>
    %c0_9 = arith.constant 0 : index
    %c0_10 = arith.constant 0 : index
    %14 = vector.load %arg1[%c0_9, %c0_10] : memref<384x384xbf16, #tpu.memory_space<vmem>>, vector<384x384xbf16>
    %cst_11 = arith.constant dense<0.000000e+00> : vector<384x1xf32>
    %15 = tpu.matmul %14, %13, %cst_11 {dimension_numbers = #tpu.dot_dimension_numbers<[1], [0], [0], [1], [0, 0, 1, 1], [], []>} : vector<384x384xbf16>, vector<384x1xbf16>, vector<384x1xf32> -> vector<384x1xf32>
    %c0_12 = arith.constant 0 : index
    %c0_13 = arith.constant 0 : index
    %16 = memref.load %arg5[%c0_12, %c0_13] : memref<1x1xf32, #tpu.memory_space<smem>>
    %17 = vector.broadcast %16 : f32 to vector<384x1xf32>
    %18 = arith.addf %15, %17 : vector<384x1xf32>
    %c0_14 = arith.constant 0 : index
    %c0_15 = arith.constant 0 : index
    %19 = vector.load %arg6[%c0_14, %c0_15] : memref<384x1xf32, #tpu.memory_space<vmem>>, vector<384x1xf32>
    tpu.vector_store %arg6[%c0_14, %c0_15], %18 {strides = array<i32>} : memref<384x1xf32, #tpu.memory_space<vmem>>, vector<384x1xf32>,
    return
  }
  func.func @transform_0(%arg0: i32) -> (i32, i32) {
    %c0_i32 = arith.constant 0 : i32
    %c0_i32_0 = arith.constant 0 : i32
    %c0_i32_1 = arith.constant 0 : i32
    return %c0_i32, %c0_i32_0 : i32, i32
  }
  func.func @transform_1(%arg0: i32) -> (i32, i32) {
    %c0_i32 = arith.constant 0 : i32
    %c0_i32_0 = arith.constant 0 : i32
    %c0_i32_1 = arith.constant 0 : i32
    return %c0_i32, %c0_i32_0 : i32, i32
  }
  func.func @transform_2(%arg0: i32) -> (i32, i32) {
    %c0_i32 = arith.constant 0 : i32
    %c0_i32_0 = arith.constant 0 : i32
    %c0_i32_1 = arith.constant 0 : i32
    return %c0_i32, %c0_i32_0 : i32, i32
  }
  func.func @transform_3(%arg0: i32) -> (i32, i32) {
    %c0_i32 = arith.constant 0 : i32
    %c0_i32_0 = arith.constant 0 : i32
    %c0_i32_1 = arith.constant 0 : i32
    return %c0_i32, %c0_i32_0 : i32, i32
  }
  func.func @transform_4(%arg0: i32) -> (i32, i32) {
    %c0_i32 = arith.constant 0 : i32
    %c0_i32_0 = arith.constant 0 : i32
    %c0_i32_1 = arith.constant 0 : i32
    return %c0_i32, %c0_i32_0 : i32, i32
  }
  func.func @transform_5(%arg0: i32) -> (i32, i32) {
    %c0_i32 = arith.constant 0 : i32
    %c0_i32_0 = arith.constant 0 : i32
    %c0_i32_1 = arith.constant 0 : i32
    return %c0_i32, %c0_i32_0 : i32, i32
  }
}

</mosaic_0001>

<bundles_post_ra>
// kernel: tpu_custom_call.1
= control target key start
LH: loop header
LB: loop body
LE: loop exit
PB: predicated region body
PF: predicated region fallthrough
CT: control target
= control target key end

     0   :  { %11 = vsyncpa [#allocation4], 0  ;;  %s3203_s0 = inlined_call_operand.hbm [shape: bf16[384,384], index: 0, kind: input, shape index: {}]   ;;  %s3204_s1 = inlined_call_operand.hbm [shape: bf16[384,128], index: 1, kind: input, shape index: {}]   ;;  %s3205_s2 = inlined_call_operand.vmem [shape: f32[1,128], index: 2, kind: input, shape index: {}]   ;;  %s3206_s3 = inlined_call_operand.vmem [shape: f32[1,128], index: 3, kind: input, shape index: {}]   ;;  %s3207_s4 = inlined_call_operand.<no memory space> [shape: f32[1,1], index: 4, kind: input, shape index: {}]   ;;  %s3208_s5 = inlined_call_operand.vmem [shape: f32[384,1], index: 5, kind: output, shape index: {}]  }
   0x1   :  { %s17_s20 = sshll.u32 %s3203_s0, 4  ;;  %s18_s20 = int_to_ptr.hbm [resolvable:$true] %s17_s20 }
   0x2   :  { %12 = vsyncpa [#allocation6], 0  ;;  %s2337_s21 = smov [#allocation3]   ;;  %s30_s25 = sshll.u32 %s3204_s1, 4  ;;  %s31_s25 = int_to_ptr.hbm [resolvable:$true] %s30_s25 }
   0x3   :  { %s19_s22 = sshll.u32 %s2337_s21, 4  ;;  %s2338_s26 = smov 192   ;;  %s20_s22 = int_to_ptr.vmem [resolvable:$true] %s19_s22 }
   0x4   :  { %s2339_s27 = smov 12   ;;  %s2340_s28 = smov [#allocation5]  }
   0x5   :  { %25 = dma.hbm_to_vmem [thread:$0]  %s18_s20, 9216, %s20_s22, [#allocation4], %s2338_s26, %s2338_s26, %s2339_s27  }
   0x6   :  { %s32_s29 = sshll.u32 %s2340_s28, 4  ;;  %s2341_s30 = smov 64   ;;  %s33_s29 = int_to_ptr.vmem [resolvable:$true] %s32_s29 }
   0x7   :  { %s2342_s6 = smov 4  }
   0x8   :  { %38 = dma.hbm_to_vmem [thread:$0]  %s31_s25, 3072, %s33_s29, [#allocation6], %s2341_s30, %s2341_s30, %s2342_s6  }
   0x9   :  { %2333 = dma.done.wait [#allocation4], 9216  }
   0xa   :  { %2334 = vsyncadd [#allocation4], 4294958080 }
   0xb   :  { %2335 = dma.done.wait [#allocation6], 3072  }
   0xc   :  { %2336 = vsyncadd [#allocation6], 4294964224  ;;  %v2243_v0 = vld [vmem:[#allocation5 + $0x38] sm:$0xff]  ;;  %v2242_v2 = vld [vmem:[#allocation5 + $0x30] sm:$0xff]  ;;  %vm1725_vm0 = vcmask 7168  }
   0xd   :  { %v2251_v1 = vld [vmem:[#allocation5 + $0x78] sm:$0xff]  ;;  %2260 = vmatpush.bf16.msra.mxu2 %v2243_v0  ;;  %v2250_v3 = vld [vmem:[#allocation5 + $0x70] sm:$0xff]  ;;  %729 = vmatpush.bf16.msra.mxu0 %v2243_v0  ;;  %v2241_v4 = vld [vmem:[#allocation5 + $0x28] sm:$0xff] }
   0xe   :  { %2268 = vmatpush.bf16.msra.mxu3 %v2251_v1  ;;  %858 = vmatpush.bf16.msra.mxu1 %v2251_v1  ;;  %v2249_v5 = vld [vmem:[#allocation5 + $0x68] sm:$0xff]  ;;  %v2240_v6 = vld [vmem:[#allocation5 + $0x20] sm:$0xff]  ;;  %v2239_v8 = vld [vmem:[#allocation5 + $0x18] sm:$0xff] }
   0xf   :  { %v2248_v7 = vld [vmem:[#allocation5 + $0x60] sm:$0xff]  ;;  %v2247_v9 = vld [vmem:[#allocation5 + $0x58] sm:$0xff]  ;;  %v2238_v10 = vld [vmem:[#allocation5 + $0x10] sm:$0xff] }
  0x10   :  { %v2246_v11 = vld [vmem:[#allocation5 + $0x50] sm:$0xff]  ;;  %v2237_v12 = vld [vmem:[#allocation5 + $0x8] sm:$0xff]  ;;  %v2236_v14 = vld [vmem:[#allocation5] sm:$0xff] }
  0x11   :  { %2261 = vmatpush.bf16.msra.mxu2 %v2242_v2  ;;  %730 = vmatpush.bf16.msra.mxu0 %v2242_v2  ;;  %v2245_v13 = vld [vmem:[#allocation5 + $0x48] sm:$0xff]  ;;  %v2244_v15 = vld [vmem:[#allocation5 + $0x40] sm:$0xff]  ;;  %v1928_v19 = vld [vmem:[#allocation3 + $0x12c] sm:$0xf0] }
  0x12   :  { %2269 = vmatpush.bf16.msra.mxu3 %v2250_v3  ;;  %859 = vmatpush.bf16.msra.mxu1 %v2250_v3  ;;  %v1926_v16 = vld [vmem:[#allocation3 + $0x120] sm:$0xf]  ;;  %v2201_v17 = vld [vmem:[#allocation3 + $0x128] sm:$0xf0]  ;;  %v2200_v18 = vld [vmem:[#allocation3 + $0x124] sm:$0xf] }
  0x13   :  { %v2379_v20 = vor.u32 %v2201_v17, %v1926_v16  ;;  %v2381_v21 = vor.u32 %v2200_v18, %v1928_v19  ;;  %v1938_v22 = vld [vmem:[#allocation3 + $0x138] sm:$0xf]  ;;  %v2204_v23 = vld [vmem:[#allocation3 + $0x140] sm:$0xf0]  ;;  %v2203_v24 = vld [vmem:[#allocation3 + $0x13c] sm:$0xf] }
  0x14   :  { %v1940_v25 = vld [vmem:[#allocation3 + $0x144] sm:$0xf0]  ;;  %v2385_v26 = vor.u32 %v2204_v23, %v1938_v22  ;;  %v1950_v28 = vld [vmem:[#allocation3 + $0x150] sm:$0xf]  ;;  %v2207_v29 = vld [vmem:[#allocation3 + $0x158] sm:$0xf0] }
  0x15   :  { %2262 = vmatpush.bf16.msra.mxu2 %v2241_v4  ;;  %731 = vmatpush.bf16.msra.mxu0 %v2241_v4  ;;  %3271 = vst [vmem:[#allocation9_spill] sm:$0xff] %v2379_v20  ;;  %v2387_v27 = vor.u32 %v2203_v24, %v1940_v25  ;;  %v2206_v30 = vld [vmem:[#allocation3 + $0x154] sm:$0xf]  ;;  %v1952_v31 = vld [vmem:[#allocation3 + $0x15c] sm:$0xf0]  ;;  %v2391_v32 = vor.u32 %v2207_v29, %v1950_v28  ;;  %v2255_v22 = vld [vmem:[#allocation5 + $0x98] sm:$0xff] }
  0x16   :  { %2270 = vmatpush.bf16.msra.mxu3 %v2249_v5  ;;  %860 = vmatpush.bf16.msra.mxu1 %v2249_v5  ;;  %3272 = vst [vmem:[#allocation10_spill] sm:$0xff] %v2381_v21  ;;  %v2393_v33 = vor.u32 %v2206_v30, %v1952_v31  ;;  %v1962_v34 = vld [vmem:[#allocation3 + $0x168] sm:$0xf]  ;;  %v2210_v35 = vld [vmem:[#allocation3 + $0x170] sm:$0xf0]  ;;  %v2256_v17 = vld [vmem:[#allocation5 + $0xa0] sm:$0xff] }
  0x17   :  { %3273 = vst [vmem:[#allocation11_spill] sm:$0xff] %v2385_v26  ;;  %v2209_v36 = vld [vmem:[#allocation3 + $0x16c] sm:$0xf]  ;;  %v1964_v37 = vld [vmem:[#allocation3 + $0x174] sm:$0xf0]  ;;  %v2397_v38 = vor.u32 %v2210_v35, %v1962_v34  ;;  %v2254_v25 = vld [vmem:[#allocation5 + $0x90] sm:$0xff] }
  0x18   :  { %3274 = vst [vmem:[#allocation12_spill] sm:$0xff] %v2387_v27  ;;  %v2399_v39 = vor.u32 %v2209_v36, %v1964_v37  ;;  %v1974_v40 = vld [vmem:[#allocation3 + $0x180] sm:$0xf]  ;;  %v2213_v41 = vld [vmem:[#allocation3 + $0x188] sm:$0xf0] }
  0x19   :  { %2263 = vmatpush.bf16.msra.mxu2 %v2240_v6  ;;  %732 = vmatpush.bf16.msra.mxu0 %v2240_v6  ;;  %3275 = vst [vmem:[#allocation13_spill] sm:$0xff] %v2391_v32  ;;  %v2212_v42 = vld [vmem:[#allocation3 + $0x184] sm:$0xf]  ;;  %v1976_v43 = vld [vmem:[#allocation3 + $0x18c] sm:$0xf0]  ;;  %v2403_v44 = vor.u32 %v2213_v41, %v1974_v40  ;;  %v2259_v6 = vld [vmem:[#allocation5 + $0xb8] sm:$0xff] }
  0x1a   :  { %2271 = vmatpush.bf16.msra.mxu3 %v2248_v7  ;;  %861 = vmatpush.bf16.msra.mxu1 %v2248_v7  ;;  %3276 = vst [vmem:[#allocation14_spill] sm:$0xff] %v2393_v33  ;;  %v2405_v45 = vor.u32 %v2212_v42, %v1976_v43  ;;  %v1986_v46 = vld [vmem:[#allocation3 + $0x198] sm:$0xf]  ;;  %v2216_v47 = vld [vmem:[#allocation3 + $0x1a0] sm:$0xf0]  ;;  %v2253_v28 = vld [vmem:[#allocation5 + $0x88] sm:$0xff] }
  0x1b   :  { %3277 = vst [vmem:[#allocation15_spill] sm:$0xff] %v2397_v38  ;;  %v2215_v48 = vld [vmem:[#allocation3 + $0x19c] sm:$0xf]  ;;  %v1988_v49 = vld [vmem:[#allocation3 + $0x1a4] sm:$0xf0]  ;;  %v2409_v50 = vor.u32 %v2216_v47, %v1986_v46  ;;  %v2252_v37 = vld [vmem:[#allocation5 + $0x80] sm:$0xff] }
  0x1c   :  { %3278 = vst [vmem:[#allocation16_spill] sm:$0xff] %v2399_v39  ;;  %v2411_v51 = vor.u32 %v2215_v48, %v1988_v49  ;;  %v1998_v52 = vld [vmem:[#allocation3 + $0x1b0] sm:$0xf]  ;;  %v2219_v53 = vld [vmem:[#allocation3 + $0x1b8] sm:$0xf0] }
  0x1d   :  { %2264 = vmatpush.bf16.msra.mxu2 %v2239_v8  ;;  %733 = vmatpush.bf16.msra.mxu0 %v2239_v8  ;;  %3279 = vst [vmem:[#allocation17_spill] sm:$0xff] %v2403_v44  ;;  %v2218_v54 = vld [vmem:[#allocation3 + $0x1b4] sm:$0xf]  ;;  %v2000_v55 = vld [vmem:[#allocation3 + $0x1bc] sm:$0xf0]  ;;  %v2415_v56 = vor.u32 %v2219_v53, %v1998_v52 }
  0x1e   :  { %2272 = vmatpush.bf16.msra.mxu3 %v2247_v9  ;;  %862 = vmatpush.bf16.msra.mxu1 %v2247_v9  ;;  %3280 = vst [vmem:[#allocation18_spill] sm:$0xff] %v2405_v45  ;;  %v2417_v57 = vor.u32 %v2218_v54, %v2000_v55  ;;  %v2010_v58 = vld [vmem:[#allocation3 + $0x1c8] sm:$0xf]  ;;  %v2222_v59 = vld [vmem:[#allocation3 + $0x1d0] sm:$0xf0] }
  0x1f   :  { %3281 = vst [vmem:[#allocation19_spill] sm:$0xff] %v2409_v50  ;;  %v2221_v60 = vld [vmem:[#allocation3 + $0x1cc] sm:$0xf]  ;;  %v2012_v61 = vld [vmem:[#allocation3 + $0x1d4] sm:$0xf0]  ;;  %v2421_v62 = vor.u32 %v2222_v59, %v2010_v58  ;;  %v2258_v9 = vld [vmem:[#allocation5 + $0xb0] sm:$0xff] }
  0x20   :  { %3282 = vst [vmem:[#allocation20_spill] sm:$0xff] %v2411_v51  ;;  %v2423_v63 = vor.u32 %v2221_v60, %v2012_v61  ;;  %v2022_v0 = vld [vmem:[#allocation3 + $0x1e0] sm:$0xf]  ;;  %v2225_v1 = vld [vmem:[#allocation3 + $0x1e8] sm:$0xf0] }
  0x21   :  { %2265 = vmatpush.bf16.msra.mxu2 %v2238_v10  ;;  %734 = vmatpush.bf16.msra.mxu0 %v2238_v10  ;;  %3283 = vst [vmem:[#allocation21_spill] sm:$0xff] %v2415_v56  ;;  %v2224_v2 = vld [vmem:[#allocation3 + $0x1e4] sm:$0xf]  ;;  %v2024_v3 = vld [vmem:[#allocation3 + $0x1ec] sm:$0xf0]  ;;  %v2427_v4 = vor.u32 %v2225_v1, %v2022_v0  ;;  %v2257_v10 = vld [vmem:[#allocation5 + $0xa8] sm:$0xff] }
  0x22   :  { %2273 = vmatpush.bf16.msra.mxu3 %v2246_v11  ;;  %863 = vmatpush.bf16.msra.mxu1 %v2246_v11  ;;  %3284 = vst [vmem:[#allocation22_spill] sm:$0xff] %v2417_v57  ;;  %v2429_v5 = vor.u32 %v2224_v2, %v2024_v3  ;;  %v2034_v11 = vld [vmem:[#allocation3 + $0x1f8] sm:$0xf]  ;;  %v2046_v29 = vld [vmem:[#allocation3 + $0x210] sm:$0xf] }
  0x23   :  { %3285 = vst [vmem:[#allocation23_spill] sm:$0xff] %v2421_v62  ;;  %v2231_v30 = vld [vmem:[#allocation3 + $0x218] sm:$0xf0]  ;;  %v2230_v31 = vld [vmem:[#allocation3 + $0x214] sm:$0xf] }
  0x24   :  { %3286 = vst [vmem:[#allocation24_spill] sm:$0xff] %v2423_v63  ;;  %v2048_v34 = vld [vmem:[#allocation3 + $0x21c] sm:$0xf0]  ;;  %v2455_v40 = vor.u32 %v2231_v30, %v2046_v29  ;;  %v2165_v43 = vld [vmem:[#allocation3 + $0x8] sm:$0xf0] }
  0x25   :  { %2266 = vmatpush.bf16.msra.mxu2 %v2237_v12  ;;  %735 = vmatpush.bf16.msra.mxu0 %v2237_v12  ;;  %3287 = vst [vmem:[#allocation25_spill] sm:$0xff] %v2427_v4  ;;  %v2228_v12 = vld [vmem:[#allocation3 + $0x200] sm:$0xf0]  ;;  %v2457_v41 = vor.u32 %v2230_v31, %v2048_v34  ;;  %v1782_v42 = vld [vmem:[#allocation3] sm:$0xf] }
  0x26   :  { %2274 = vmatpush.bf16.msra.mxu3 %v2245_v13  ;;  %864 = vmatpush.bf16.msra.mxu1 %v2245_v13  ;;  %3288 = vst [vmem:[#allocation26_spill] sm:$0xff] %v2429_v5  ;;  %v2227_v13 = vld [vmem:[#allocation3 + $0x1fc] sm:$0xf]  ;;  %v2441_v18 = vor.u32 %v2228_v12, %v2034_v11  ;;  %v2461_v46 = vor.u32 %v2165_v43, %v1782_v42  ;;  %v2164_v47 = vld [vmem:[#allocation3 + $0x4] sm:$0xf] }
  0x27   :  { %3291 = vst [vmem:[#allocation29_spill] sm:$0xff] %v2455_v40  ;;  %v1784_v48 = vld [vmem:[#allocation3 + $0xc] sm:$0xf0]  ;;  %v2058_v54 = vld [vmem:[#allocation3 + $0x228] sm:$0xf] }
  0x28   :  { %3289 = vst [vmem:[#allocation27_spill] sm:$0xff] %v2441_v18  ;;  %v2464_v49 = vor.u32 %v2164_v47, %v1784_v48  ;;  %v2234_v55 = vld [vmem:[#allocation3 + $0x230] sm:$0xf0]  ;;  %v2233_v58 = vld [vmem:[#allocation3 + $0x22c] sm:$0xf] }
  0x29   :  { %2267 = vmatpush.bf16.msra.mxu2 %v2236_v14  ;;  %736 = vmatpush.bf16.msra.mxu0 %v2236_v14  ;;  %v2036_v14 = vld [vmem:[#allocation3 + $0x204] sm:$0xf0]  ;;  %3292 = vst [vmem:[#allocation30_spill] sm:$0xff] %v2457_v41  ;;  %v2060_v59 = vld [vmem:[#allocation3 + $0x234] sm:$0xf0]  ;;  %v2475_v0 = vor.u32 %v2234_v55, %v2058_v54 }
  0x2a   :  { %2275 = vmatpush.bf16.msra.mxu3 %v2244_v15  ;;  %865 = vmatpush.bf16.msra.mxu1 %v2244_v15  ;;  %v2443_v19 = vor.u32 %v2227_v13, %v2036_v14  ;;  %3293 = vst [vmem:[#allocation31_spill] sm:$0xff] %v2464_v49  ;;  %v2477_v1 = vor.u32 %v2233_v58, %v2060_v59  ;;  %v1794_v2 = vld [vmem:[#allocation3 + $0x18] sm:$0xf]  ;;  %v2168_v3 = vld [vmem:[#allocation3 + $0x20] sm:$0xf0] }
  0x2b   :  { %3294 = vst [vmem:[#allocation32_spill] sm:$0xff] %v2475_v0  ;;  %v1790_v14 = vld [vmem:[#allocation3 + $0x8] sm:$0xf]  ;;  %v1806_v29 = vld [vmem:[#allocation3 + $0x30] sm:$0xf] }
  0x2c   :  { %797 = vmatmul.bf16.vlgmr.msra.gmra.mxu2 %v2379_v20  ;;  %3290 = vst [vmem:[#allocation28_spill] sm:$0xff] %v2443_v19  ;;  %737 = vmatmul.bf16.vlgmr.msra.gmra.mxu0 %v2461_v46  ;;  %v2171_v30 = vld [vmem:[#allocation3 + $0x38] sm:$0xf0]  ;;  %v2170_v34 = vld [vmem:[#allocation3 + $0x34] sm:$0xf] }
  0x2d   :  { %926 = vmatmul.bf16.vlgmr.msra.gmra.mxu3 %v2381_v21  ;;  %987 = vmatpush.bf16.msrb.mxu2 %v2259_v6  ;;  %3295 = vst [vmem:[#allocation33_spill] sm:$0xff] %v2477_v1  ;;  %v2481_v6 = vor.u32 %v2168_v3, %v1794_v2  ;;  %v2498_v31 = vor.u32 %v2171_v30, %v1806_v29  ;;  %v1802_v48 = vld [vmem:[#allocation3 + $0x20] sm:$0xf]  ;;  %v2169_v54 = vld [vmem:[#allocation3 + $0x28] sm:$0xf0] }
  0x2e   :  { %866 = vmatmul.bf16.vlgmr.msra.gmra.mxu1 %v2464_v49  ;;  %v2512_v59 = vor.u32 %v2169_v54, %v1802_v48  ;;  %v1818_v2 = vld [vmem:[#allocation3 + $0x48] sm:$0xf]  ;;  %v2174_v3 = vld [vmem:[#allocation3 + $0x50] sm:$0xf0]  ;;  %v1814_v54 = vld [vmem:[#allocation3 + $0x38] sm:$0xf] }
  0x2f   :  { %v1866_v21 = vld [vmem:[#allocation3 + $0xa8] sm:$0xf]  ;;  %v1902_v49 = vld [vmem:[#allocation3 + $0xf0] sm:$0xf] }
  0x30   :  { %3299 = vst [vmem:[#allocation37_spill] sm:$0xff] %v2512_v59 }
  0x31   :  { %988 = vmatpush.bf16.msrb.mxu2 %v2258_v9  ;;  %v2167_v9 = vld [vmem:[#allocation3 + $0x1c] sm:$0xf] }
  0x35   :  { %989 = vmatpush.bf16.msrb.mxu2 %v2257_v10  ;;  %v1796_v10 = vld [vmem:[#allocation3 + $0x24] sm:$0xf0] }
  0x36   :  { %v2484_v11 = vor.u32 %v2167_v9, %v1796_v10  ;;  %v2515_v9 = vor.u32 %v2174_v3, %v1818_v2  ;;  %v2173_v10 = vld [vmem:[#allocation3 + $0x4c] sm:$0xf]  ;;  %v2172_v2 = vld [vmem:[#allocation3 + $0x40] sm:$0xf0] }
  0x38   :  { %3296 = vst [vmem:[#allocation34_spill] sm:$0xff] %v2484_v11 }
  0x39   :  { %990 = vmatpush.bf16.msrb.mxu2 %v2256_v17  ;;  %v2166_v17 = vld [vmem:[#allocation3 + $0x10] sm:$0xf0] }
  0x3c   :  { %802 = vmatmul.bf16.gmra.mxu2 %v2385_v26  ;;  %742 = vmatmul.bf16.gmra.mxu0 %v2481_v6  ;;  %v1878_v26 = vld [vmem:[#allocation3 + $0xc0] sm:$0xf] }
  0x3d   :  { %931 = vmatmul.bf16.gmra.mxu3 %v2387_v27  ;;  %991 = vmatpush.bf16.msrb.mxu2 %v2255_v22  ;;  %v1850_v27 = vld [vmem:[#allocation3 + $0x80] sm:$0xf] }
  0x3e   :  { %871 = vmatmul.bf16.gmra.mxu1 %v2484_v11 }
  0x41   :  { %992 = vmatpush.bf16.msrb.mxu2 %v2254_v25 }
  0x45   :  { %993 = vmatpush.bf16.msrb.mxu2 %v2253_v28  ;;  %v2495_v28 = vor.u32 %v2166_v17, %v1790_v14  ;;  %v1820_v14 = vld [vmem:[#allocation3 + $0x54] sm:$0xf0]  ;;  %v2520_v17 = vld [vmem:[%s3205_s2] ss:$0 sm:$0xff] }
  0x46   :  { %v2523_v29 = vor.u32 %v2173_v10, %v1820_v14  ;;  %v2176_v14 = vld [vmem:[#allocation3 + $0x64] sm:$0xf] }
  0x47   :  { %3297 = vst [vmem:[#allocation35_spill] sm:$0xff] %v2495_v28 }
  0x48   :  { %3300 = vst [vmem:[#allocation38_spill] sm:$0xff] %v2523_v29 }
  0x49   :  { %994 = vmatpush.bf16.msrb.mxu2 %v2252_v37  ;;  %v1808_v37 = vld [vmem:[#allocation3 + $0x3c] sm:$0xf0] }
  0x4a   :  { %v2501_v42 = vor.u32 %v2170_v34, %v1808_v37 }
  0x4c   :  { %807 = vmatmul.bf16.gmra.mxu2 %v2391_v32  ;;  %747 = vmatmul.bf16.gmra.mxu0 %v2498_v31  ;;  %3298 = vst [vmem:[#allocation36_spill] sm:$0xff] %v2501_v42 }
  0x4d   :  { %936 = vmatmul.bf16.gmra.mxu3 %v2393_v33  ;;  %v2183_v33 = vld [vmem:[#allocation3 + $0x98] sm:$0xf0] }
  0x4e   :  { %876 = vmatmul.bf16.gmra.mxu1 %v2501_v42 }
  0x5c   :  { %812 = vmatmul.bf16.gmra.mxu2 %v2397_v38  ;;  %752 = vmatmul.bf16.gmra.mxu0 %v2515_v9  ;;  %v2184_v38 = vld [vmem:[#allocation3 + $0xa0] sm:$0xf0] }
  0x5d   :  { %941 = vmatmul.bf16.gmra.mxu3 %v2399_v39  ;;  %v2178_v39 = vld [vmem:[#allocation3 + $0x70] sm:$0xf0] }
  0x5e   :  { %881 = vmatmul.bf16.gmra.mxu1 %v2523_v29 }
  0x6c   :  { %817 = vmatmul.bf16.gmra.mxu2 %v2403_v44  ;;  %v1862_v44 = vld [vmem:[#allocation3 + $0x98] sm:$0xf] }
  0x6d   :  { %946 = vmatmul.bf16.gmra.mxu3 %v2405_v45  ;;  %v2180_v45 = vld [vmem:[#allocation3 + $0x80] sm:$0xf0] }
  0x7c   :  { %822 = vmatmul.bf16.gmra.mxu2 %v2409_v50  ;;  %v1868_v50 = vld [vmem:[#allocation3 + $0xb4] sm:$0xf0] }
  0x7d   :  { %951 = vmatmul.bf16.gmra.mxu3 %v2411_v51  ;;  %v2175_v51 = vld [vmem:[#allocation3 + $0x58] sm:$0xf0] }
  0x8c   :  { %827 = vmatmul.bf16.gmra.mxu2 %v2415_v56  ;;  %v2186_v56 = vld [vmem:[#allocation3 + $0xb0] sm:$0xf0] }
  0x8d   :  { %956 = vmatmul.bf16.gmra.mxu3 %v2417_v57 }
  0x9c   :  { %832 = vmatmul.bf16.gmra.mxu2 %v2421_v62  ;;  %v2181_v62 = vld [vmem:[#allocation3 + $0x88] sm:$0xf0] }
  0x9d   :  { %961 = vmatmul.bf16.gmra.mxu3 %v2423_v63 }
  0xa9   :  { %v738_v32 = vpop.f32.mrf.mxu0 }
  0xac   :  { %837 = vmatmul.bf16.gmra.mxu2 %v2427_v4  ;;  %v1856_v4 = vld [vmem:[#allocation3 + $0x9c] sm:$0xf0] }
  0xad   :  { %966 = vmatmul.bf16.gmra.mxu3 %v2429_v5  ;;  %v2177_v5 = vld [vmem:[#allocation3 + $0x68] sm:$0xf0] }
  0xaf   :  { %v2433_v7 = vpop.f32.mrf.mxu2 }
  0xb0   :  { %v2435_v8 = vpop.f32.mrf.mxu3 }
  0xb7   :  { %v2437_v15 = vpop.f32.mrf.mxu2 }
  0xb8   :  { %v2439_v16 = vpop.f32.mrf.mxu3 }
  0xbc   :  { %842 = vmatmul.bf16.gmra.mxu2 %v2441_v18  ;;  %v1854_v18 = vld [vmem:[#allocation3 + $0x90] sm:$0xf] }
  0xbd   :  { %971 = vmatmul.bf16.gmra.mxu3 %v2443_v19  ;;  %v1830_v19 = vld [vmem:[#allocation3 + $0x60] sm:$0xf] }
  0xbe   :  { %v2536_v10 = vor.u32 %v2177_v5, %v1830_v19  ;;  %v1842_v19 = vld [vmem:[#allocation3 + $0x78] sm:$0xf] }
  0xbf   :  { %v2447_v23 = vpop.f32.mrf.mxu2 }
  0xc0   :  { %v2449_v24 = vpop.f32.mrf.mxu3  ;;  %757 = vmatmul.bf16.gmra.mxu0 %v2536_v10 }
  0xc7   :  { %v2451_v35 = vpop.f32.mrf.mxu2 }
  0xc8   :  { %v2453_v36 = vpop.f32.mrf.mxu3 }
  0xcc   :  { %847 = vmatmul.bf16.gmra.mxu2 %v2455_v40  ;;  %v1844_v40 = vld [vmem:[#allocation3 + $0x84] sm:$0xf0] }
  0xcd   :  { %976 = vmatmul.bf16.gmra.mxu3 %v2457_v41  ;;  %v2533_v41 = vor.u32 %v2172_v2, %v1814_v54  ;;  %v1826_v2 = vld [vmem:[#allocation3 + $0x50] sm:$0xf] }
  0xce   :  { %v2547_v5 = vor.u32 %v2175_v51, %v1826_v2 }
  0xcf   :  { %v2466_v52 = vpop.f32.mrf.mxu2  ;;  %3301 = vst [vmem:[#allocation39_spill] sm:$0xff] %v2533_v41 }
  0xd0   :  { %v2468_v53 = vpop.f32.mrf.mxu3  ;;  %3303 = vst [vmem:[#allocation41_spill] sm:$0xff] %v2547_v5 }
  0xd7   :  { %v2471_v60 = vpop.f32.mrf.mxu2 }
  0xd8   :  { %v2473_v61 = vpop.f32.mrf.mxu3 }
  0xdc   :  { %852 = vmatmul.bf16.gmra.mxu2 %v2475_v0 }
  0xdd   :  { %981 = vmatmul.bf16.gmra.mxu3 %v2477_v1 }
  0xdf   :  { %v2486_v12 = vpop.f32.mrf.mxu2 }
  0xe0   :  { %v2488_v13 = vpop.f32.mrf.mxu3 }
  0xe7   :  { %v2491_v22 = vpop.f32.mrf.mxu2 }
  0xe8   :  { %v2493_v25 = vpop.f32.mrf.mxu3 }
  0xec   :  { %995 = vmatmul.bf16.vlgmr.msrb.gmra.mxu2 %v2495_v28  ;;  %v2195_v28 = vld [vmem:[#allocation3 + $0xf8] sm:$0xf0] }
  0xef   :  { %v2503_v43 = vpop.f32.mrf.mxu2 }
  0xf0   :  { %v2505_v47 = vpop.f32.mrf.mxu3 }
  0xf7   :  { %v2508_v55 = vpop.f32.mrf.mxu2 }
  0xf8   :  { %v2510_v58 = vpop.f32.mrf.mxu3 }
  0xfc   :  { %1000 = vmatmul.bf16.gmra.mxu2 %v2512_v59 }
  0xff   :  { %v823_v30 = vpop.f32.mrf.mxu2 }
 0x100   :  { %v952_v34 = vpop.f32.mrf.mxu3  ;;  %v824_v37 = vadd.f32 %v2520_v17, %v823_v30  ;;  %v1832_v30 = vld [vmem:[#allocation3 + $0x6c] sm:$0xf0] }
 0x102   :  { %v2527_v48 = vadd.f32 %v952_v34, %v824_v37  ;;  %v2539_v34 = vor.u32 %v2176_v14, %v1832_v30  ;;  %v2550_v14 = vor.u32 %v2180_v45, %v1842_v19  ;;  %v2179_v30 = vld [vmem:[#allocation3 + $0x7c] sm:$0xf]  ;;  %v2563_v45 = vor.u32 %v2183_v33, %v1854_v18  ;;  %v2182_v19 = vld [vmem:[#allocation3 + $0x94] sm:$0xf]  ;;  %v2185_v18 = vld [vmem:[#allocation3 + $0xac] sm:$0xf] }
 0x103   :  { %v2576_v33 = vor.u32 %v2186_v56, %v1866_v21  ;;  %v2189_v21 = vld [vmem:[#allocation3 + $0xc8] sm:$0xf0] }
 0x104   :  { %3302 = vst [vmem:[#allocation40_spill] sm:$0xff] %v2539_v34  ;;  %886 = vmatmul.bf16.gmra.mxu1 %v2539_v34  ;;  %762 = vmatmul.bf16.gmra.mxu0 %v2550_v14  ;;  %v2589_v56 = vor.u32 %v2189_v21, %v1878_v26  ;;  %v1890_v21 = vld [vmem:[#allocation3 + $0xd8] sm:$0xf] }
 0x105   :  { %3304 = vst [vmem:[#allocation42_spill] sm:$0xff] %v2550_v14  ;;  %v1914_v14 = vld [vmem:[#allocation3 + $0x108] sm:$0xf] }
 0x106   :  { %3307 = vst [vmem:[#allocation45_spill] sm:$0xff] %v2563_v45 }
 0x107   :  { %v2529_v3 = vpop.f32.mrf.mxu2  ;;  %3310 = vst [vmem:[#allocation48_spill] sm:$0xff] %v2576_v33 }
 0x108   :  { %v2531_v1 = vpop.f32.mrf.mxu3  ;;  %3313 = vst [vmem:[#allocation51_spill] sm:$0xff] %v2589_v56 }
 0x10c   :  { %1005 = vmatmul.bf16.gmra.mxu2 %v2533_v41  ;;  %v2190_v41 = vld [vmem:[#allocation3 + $0xd0] sm:$0xf0] }
 0x10f   :  { %v828_v37 = vpop.f32.mrf.mxu2 }
 0x110   :  { %v957_v63 = vpop.f32.mrf.mxu3  ;;  %v829_v57 = vadd.f32 %v2520_v17, %v828_v37  ;;  %v2553_v37 = vor.u32 %v2179_v30, %v1844_v40  ;;  %v2566_v40 = vor.u32 %v2182_v19, %v1856_v4  ;;  %v2579_v4 = vor.u32 %v2185_v18, %v1868_v50  ;;  %v2188_v50 = vld [vmem:[#allocation3 + $0xc4] sm:$0xf]  ;;  %v1880_v18 = vld [vmem:[#allocation3 + $0xcc] sm:$0xf0] }
 0x111   :  { %v2592_v20 = vor.u32 %v2188_v50, %v1880_v18  ;;  %v2191_v18 = vld [vmem:[#allocation3 + $0xdc] sm:$0xf] }
 0x112   :  { %v2543_v54 = vadd.f32 %v957_v63, %v829_v57  ;;  %3305 = vst [vmem:[#allocation43_spill] sm:$0xff] %v2553_v37  ;;  %v1838_v63 = vld [vmem:[#allocation3 + $0x68] sm:$0xf] }
 0x113   :  { %v2560_v2 = vor.u32 %v2178_v39, %v1838_v63  ;;  %3308 = vst [vmem:[#allocation46_spill] sm:$0xff] %v2566_v40  ;;  %v2573_v63 = vor.u32 %v2181_v62, %v1850_v27  ;;  %v2586_v62 = vor.u32 %v2184_v38, %v1862_v44  ;;  %v740_v38 = vpop.f32.mrf.mxu0  ;;  %v1874_v44 = vld [vmem:[#allocation3 + $0xb0] sm:$0xf] }
 0x114   :  { %891 = vmatmul.bf16.gmra.mxu1 %v2553_v37  ;;  %767 = vmatmul.bf16.gmra.mxu0 %v2563_v45  ;;  %3311 = vst [vmem:[#allocation49_spill] sm:$0xff] %v2579_v4  ;;  %v2187_v37 = vld [vmem:[#allocation3 + $0xb8] sm:$0xf0] }
 0x115   :  { %3306 = vst [vmem:[#allocation44_spill] sm:$0xff] %v2560_v2 }
 0x116   :  { %3309 = vst [vmem:[#allocation47_spill] sm:$0xff] %v2573_v63 }
 0x117   :  { %v2545_v0 = vpop.f32.mrf.mxu2  ;;  %3312 = vst [vmem:[#allocation50_spill] sm:$0xff] %v2586_v62 }
 0x118   :  { %3314 = vst [vmem:[#allocation52_spill] sm:$0xff] %v2592_v20 }
 0x11b   :  { %v743_v26 = vpop.f32.mrf.mxu0 }
 0x11c   :  { %1010 = vmatmul.bf16.gmra.mxu2 %v2547_v5  ;;  %v1892_v5 = vld [vmem:[#allocation3 + $0xe4] sm:$0xf0] }
 0x11f   :  { %v2555_v57 = vpop.f32.mrf.mxu2 }
 0x124   :  { %896 = vmatmul.bf16.gmra.mxu1 %v2566_v40  ;;  %772 = vmatmul.bf16.gmra.mxu0 %v2576_v33  ;;  %v867_v40 = vpop.f32.mrf.mxu1 }
 0x127   :  { %v2558_v51 = vpop.f32.mrf.mxu2 }
 0x12c   :  { %1015 = vmatmul.bf16.gmra.mxu2 %v2560_v2  ;;  %v2192_v2 = vld [vmem:[#allocation3 + $0xe0] sm:$0xf0] }
 0x12d   :  { %v2602_v29 = vor.u32 %v2192_v2, %v1890_v21  ;;  %v739_v2 = vadd.f32 %v2520_v17, %v738_v32  ;;  %v741_v32 = vadd.f32 %v2520_v17, %v740_v38  ;;  %v744_v38 = vadd.f32 %v2520_v17, %v743_v26 }
 0x12f   :  { %v2568_v30 = vpop.f32.mrf.mxu2  ;;  %3317 = vst [vmem:[#allocation55_spill] sm:$0xff] %v2602_v29 }
 0x134   :  { %901 = vmatmul.bf16.gmra.mxu1 %v2579_v4  ;;  %777 = vmatmul.bf16.gmra.mxu0 %v2589_v56  ;;  %v1904_v56 = vld [vmem:[#allocation3 + $0xfc] sm:$0xf0] }
 0x137   :  { %v2571_v39 = vpop.f32.mrf.mxu2 }
 0x13c   :  { %1020 = vmatmul.bf16.gmra.mxu2 %v2573_v63  ;;  %v869_v63 = vpop.f32.mrf.mxu1 }
 0x13f   :  { %v2581_v19 = vpop.f32.mrf.mxu2 }
 0x144   :  { %906 = vmatmul.bf16.gmra.mxu1 %v2592_v20  ;;  %v872_v50 = vpop.f32.mrf.mxu1  ;;  %782 = vmatmul.bf16.gmra.mxu0 %v2602_v29  ;;  %v2605_v20 = vor.u32 %v2191_v18, %v1892_v5  ;;  %v868_v5 = vadd.f32 %v867_v40, %v739_v2  ;;  %v2616_v18 = vor.u32 %v2195_v28, %v1902_v49  ;;  %v1898_v2 = vld [vmem:[#allocation3 + $0xe0] sm:$0xf] }
 0x145   :  { %v870_v40 = vadd.f32 %v869_v63, %v741_v32 }
 0x146   :  { %3318 = vst [vmem:[#allocation56_spill] sm:$0xff] %v2605_v20 }
 0x147   :  { %v2584_v27 = vpop.f32.mrf.mxu2  ;;  %3322 = vst [vmem:[#allocation60_spill] sm:$0xff] %v2616_v18 }
 0x14c   :  { %1025 = vmatmul.bf16.gmra.mxu2 %v2586_v62  ;;  %v2599_v62 = vor.u32 %v2187_v37, %v1874_v44  ;;  %v745_v37 = vpop.f32.mrf.mxu0  ;;  %v1886_v44 = vld [vmem:[#allocation3 + $0xc8] sm:$0xf]  ;;  %v874_v11 = vpop.f32.mrf.mxu1 }
 0x14d   :  { %v2613_v21 = vor.u32 %v2190_v41, %v1886_v44  ;;  %v2625_v41 = vld [vmem:[%s3206_s3] ss:$0 sm:$0xff] }
 0x14e   :  { %3316 = vst [vmem:[#allocation54_spill] sm:$0xff] %v2599_v62 }
 0x14f   :  { %v2594_v4 = vpop.f32.mrf.mxu2  ;;  %3321 = vst [vmem:[#allocation59_spill] sm:$0xff] %v2613_v21 }
 0x154   :  { %911 = vmatmul.bf16.gmra.mxu1 %v2605_v20  ;;  %v877_v29 = vpop.f32.mrf.mxu1  ;;  %v2194_v20 = vld [vmem:[#allocation3 + $0xf4] sm:$0xf]  ;;  %787 = vmatmul.bf16.gmra.mxu0 %v2616_v18 }
 0x155   :  { %v2619_v33 = vor.u32 %v2194_v20, %v1904_v56 }
 0x157   :  { %v2597_v34 = vpop.f32.mrf.mxu2  ;;  %3323 = vst [vmem:[#allocation61_spill] sm:$0xff] %v2619_v33 }
 0x158   :  { %3315 = vst [vmem:[#allocation53_spill] sm:$0xff] %v2597_v34  ;;  %v2198_v34 = vld [vmem:[#allocation3 + $0x110] sm:$0xf0] }
 0x159   :  { %v2634_v32 = vor.u32 %v2198_v34, %v1914_v14  ;;  %v1910_v14 = vld [vmem:[#allocation3 + $0xf8] sm:$0xf] }
 0x15b   :  { %3325 = vst [vmem:[#allocation63_spill] sm:$0xff] %v2634_v32 }
 0x15c   :  { %1030 = vmatmul.bf16.gmra.mxu2 %v2599_v62  ;;  %v748_v62 = vpop.f32.mrf.mxu0  ;;  %v879_v20 = vpop.f32.mrf.mxu1 }
 0x15f   :  { %v2607_v42 = vpop.f32.mrf.mxu2 }
 0x160   :  { %3319 = vst [vmem:[#allocation57_spill] sm:$0xff] %v2607_v42 }
 0x164   :  { %916 = vmatmul.bf16.gmra.mxu1 %v2619_v33  ;;  %v750_v28 = vpop.f32.mrf.mxu0  ;;  %v2197_v33 = vld [vmem:[#allocation3 + $0x10c] sm:$0xf]  ;;  %792 = vmatmul.bf16.gmra.mxu0 %v2634_v32 }
 0x167   :  { %v2610_v59 = vpop.f32.mrf.mxu2 }
 0x168   :  { %3320 = vst [vmem:[#allocation58_spill] sm:$0xff] %v2610_v59 }
 0x16c   :  { %1035 = vmatmul.bf16.gmra.mxu2 %v2613_v21  ;;  %v2193_v21 = vld [vmem:[#allocation3 + $0xe8] sm:$0xf0]  ;;  %v753_v42 = vpop.f32.mrf.mxu0 }
 0x16f   :  { %v996_v45 = vpop.f32.mrf.mxu2 }
 0x170   :  { %v997_v59 = vadd.f32 %v996_v45, %v868_v5  ;;  %v2630_v5 = vor.u32 %v2193_v21, %v1898_v2  ;;  %v746_v2 = vadd.f32 %v2520_v17, %v745_v37 }
 0x172   :  { %v1116_v49 = vmax.f32 %v997_v59, 0.0  ;;  %3324 = vst [vmem:[#allocation62_spill] sm:$0xff] %v2630_v5  ;;  %v873_v59 = vadd.f32 %v872_v50, %v744_v38 }
 0x174   :  { %v1168_v44 = vmul.f32 %v2625_v41, %v1116_v49  ;;  %v882_v49 = vpop.f32.mrf.mxu1  ;;  %v755_v50 = vpop.f32.mrf.mxu0 }
 0x176   :  { %1216 = vadd.xlane.f32.xlu1 %v1168_v44  ;;  %v1916_v44 = vld [vmem:[#allocation3 + $0x114] sm:$0xf0] }
 0x177   :  { %v998_v56 = vpop.f32.mrf.mxu2  ;;  %v2637_v26 = vor.u32 %v2197_v33, %v1916_v44  ;;  %v749_v33 = vadd.f32 %v2520_v17, %v748_v62 }
 0x178   :  { %v999_v45 = vadd.f32 %v998_v56, %v870_v40 }
 0x179   :  { %3326 = vst [vmem:[#allocation64_spill] sm:$0xff] %v2637_v26  ;;  %921 = vmatmul.bf16.gmra.mxu1 %v2637_v26  ;;  %v878_v37 = vadd.f32 %v877_v29, %v749_v33  ;;  %v751_v26 = vadd.f32 %v2520_v17, %v750_v28  ;;  %v754_v29 = vadd.f32 %v2520_v17, %v753_v42 }
 0x17a   :  { %v1117_v18 = vmax.f32 %v999_v45, 0.0  ;;  %v875_v45 = vadd.f32 %v874_v11, %v746_v2 }
 0x17b   :  { %v883_v28 = vadd.f32 %v882_v49, %v754_v29 }
 0x17c   :  { %1040 = vmatmul.bf16.gmra.mxu2 %v2630_v5  ;;  %v1169_v63 = vmul.f32 %v2625_v41, %v1117_v18  ;;  %v2196_v18 = vld [vmem:[#allocation3 + $0x100] sm:$0xf0]  ;;  %v884_v38 = vpop.f32.mrf.mxu1 }
 0x17d   :  { %v2643_v44 = vor.u32 %v2196_v18, %v1910_v14  ;;  %v1922_v14 = vld [vmem:[#allocation3 + $0x110] sm:$0xf]  ;;  %v2199_v18 = vld [vmem:[#allocation3 + $0x118] sm:$0xf0] }
 0x17e   :  { %1218 = vadd.xlane.f32.xlu2 %v1169_v63  ;;  %v2650_v33 = vor.u32 %v2199_v18, %v1922_v14  ;;  %v1934_v14 = vld [vmem:[#allocation3 + $0x128] sm:$0xf]  ;;  %v2202_v18 = vld [vmem:[#allocation3 + $0x130] sm:$0xf0] }
 0x17f   :  { %v1001_v21 = vpop.f32.mrf.mxu2  ;;  %3327 = vst [vmem:[#allocation65_spill] sm:$0xff] %v2643_v44  ;;  %v2657_v29 = vor.u32 %v2202_v18, %v1934_v14  ;;  %v1946_v14 = vld [vmem:[#allocation3 + $0x140] sm:$0xf]  ;;  %v2205_v18 = vld [vmem:[#allocation3 + $0x148] sm:$0xf0] }
 0x180   :  { %v1002_v40 = vadd.f32 %v1001_v21, %v873_v59  ;;  %v758_v21 = vpop.f32.mrf.mxu0  ;;  %3328 = vst [vmem:[#allocation66_spill] sm:$0xff] %v2650_v33 }
 0x181   :  { %v759_v49 = vadd.f32 %v2520_v17, %v758_v21  ;;  %3329 = vst [vmem:[#allocation67_spill] sm:$0xff] %v2657_v29 }
 0x182   :  { %v1118_v56 = vmax.f32 %v1002_v40, 0.0 }
 0x184   :  { %v1170_v34 = vmul.f32 %v2625_v41, %v1118_v56  ;;  %v887_v11 = vpop.f32.mrf.mxu1 }
 0x186   :  { %1220 = vadd.xlane.f32.xlu1 %v1170_v34 }
 0x187   :  { %v1003_v63 = vpop.f32.mrf.mxu2 }
 0x188   :  { %v1004_v5 = vadd.f32 %v1003_v63, %v875_v45  ;;  %v760_v32 = vpop.f32.mrf.mxu0  ;;  %v880_v45 = vadd.f32 %v879_v20, %v751_v26 }
 0x18a   :  { %v1119_v59 = vmax.f32 %v1004_v5, 0.0 }
 0x18c   :  { %1045 = vmatmul.bf16.gmra.mxu2 %v2643_v44  ;;  %v1171_v40 = vmul.f32 %v2625_v41, %v1119_v59  ;;  %v889_v5 = vpop.f32.mrf.mxu1 }
 0x18e   :  { %1222 = vadd.xlane.f32.xlu2 %v1171_v40 }
 0x18f   :  { %v1006_v2 = vpop.f32.mrf.mxu2 }
 0x190   :  { %v1007_v56 = vadd.f32 %v1006_v2, %v878_v37  ;;  %v763_v40 = vpop.f32.mrf.mxu0 }
 0x192   :  { %v1120_v34 = vmax.f32 %v1007_v56, 0.0  ;;  %v756_v56 = vadd.f32 %v2520_v17, %v755_v50  ;;  %v888_v50 = vadd.f32 %v887_v11, %v759_v49  ;;  %v764_v11 = vadd.f32 %v2520_v17, %v763_v40 }
 0x193   :  { %v2664_v49 = vor.u32 %v2205_v18, %v1946_v14  ;;  %v1958_v14 = vld [vmem:[#allocation3 + $0x158] sm:$0xf]  ;;  %v2208_v18 = vld [vmem:[#allocation3 + $0x160] sm:$0xf0] }
 0x194   :  { %v1172_v62 = vmul.f32 %v2625_v41, %v1120_v34  ;;  %v892_v20 = vpop.f32.mrf.mxu1 }
 0x195   :  { %3330 = vst [vmem:[#allocation68_spill] sm:$0xff] %v2664_v49 }
 0x196   :  { %1224 = vadd.xlane.f32.xlu1 %v1172_v62 }
 0x197   :  { %v1008_v63 = vpop.f32.mrf.mxu2 }
 0x198   :  { %v1009_v44 = vadd.f32 %v1008_v63, %v880_v45  ;;  %v765_v62 = vpop.f32.mrf.mxu0  ;;  %v885_v45 = vadd.f32 %v884_v38, %v756_v56  ;;  %v761_v56 = vadd.f32 %v2520_v17, %v760_v32  ;;  %v893_v32 = vadd.f32 %v892_v20, %v764_v11 }
 0x199   :  { %v2671_v11 = vor.u32 %v2208_v18, %v1958_v14  ;;  %v1970_v18 = vld [vmem:[#allocation3 + $0x170] sm:$0xf] }
 0x19a   :  { %v1121_v59 = vmax.f32 %v1009_v44, 0.0 }
 0x19b   :  { %3331 = vst [vmem:[#allocation69_spill] sm:$0xff] %v2671_v11 }
 0x19c   :  { %1050 = vmatmul.bf16.gmra.mxu2 %v2650_v33  ;;  %v1173_v37 = vmul.f32 %v2625_v41, %v1121_v59  ;;  %v894_v44 = vpop.f32.mrf.mxu1 }
 0x19e   :  { %1226 = vadd.xlane.f32.xlu2 %v1173_v37 }
 0x19f   :  { %v1011_v26 = vpop.f32.mrf.mxu2 }
 0x1a0   :  { %v1012_v2 = vadd.f32 %v1011_v26, %v883_v28  ;;  %v768_v37 = vpop.f32.mrf.mxu0 }
 0x1a1   :  { %v769_v20 = vadd.f32 %v2520_v17, %v768_v37 }
 0x1a2   :  { %v1122_v34 = vmax.f32 %v1012_v2, 0.0 }
 0x1a4   :  { %v1174_v42 = vmul.f32 %v2625_v41, %v1122_v34  ;;  %v897_v38 = vpop.f32.mrf.mxu1 }
 0x1a6   :  { %1228 = vadd.xlane.f32.xlu1 %v1174_v42 }
 0x1a7   :  { %v1013_v63 = vpop.f32.mrf.mxu2 }
 0x1a8   :  { %v1014_v33 = vadd.f32 %v1013_v63, %v885_v45  ;;  %v770_v42 = vpop.f32.mrf.mxu0  ;;  %v890_v45 = vadd.f32 %v889_v5, %v761_v56  ;;  %v766_v56 = vadd.f32 %v2520_v17, %v765_v62  ;;  %v898_v62 = vadd.f32 %v897_v38, %v769_v20 }
 0x1aa   :  { %v1123_v59 = vmax.f32 %v1014_v33, 0.0 }
 0x1ac   :  { %1055 = vmatmul.bf16.gmra.mxu2 %v2657_v29  ;;  %v1175_v28 = vmul.f32 %v2625_v41, %v1123_v59  ;;  %v899_v33 = vpop.f32.mrf.mxu1 }
 0x1ae   :  { %1230 = vadd.xlane.f32.xlu2 %v1175_v28 }
 0x1af   :  { %v1016_v26 = vpop.f32.mrf.mxu2 }
 0x1b0   :  { %v1017_v2 = vadd.f32 %v1016_v26, %v888_v50  ;;  %v773_v28 = vpop.f32.mrf.mxu0 }
 0x1b2   :  { %v1124_v34 = vmax.f32 %v1017_v2, 0.0 }
 0x1b4   :  { %v1176_v21 = vmul.f32 %v2625_v41, %v1124_v34  ;;  %v902_v5 = vpop.f32.mrf.mxu1 }
 0x1b6   :  { %1232 = vadd.xlane.f32.xlu1 %v1176_v21 }
 0x1b7   :  { %v1018_v63 = vpop.f32.mrf.mxu2 }
 0x1b8   :  { %v1019_v29 = vadd.f32 %v1018_v63, %v890_v45  ;;  %v775_v21 = vpop.f32.mrf.mxu0  ;;  %v895_v45 = vadd.f32 %v894_v44, %v766_v56 }
 0x1ba   :  { %v1125_v59 = vmax.f32 %v1019_v29, 0.0 }
 0x1bc   :  { %1060 = vmatmul.bf16.gmra.mxu2 %v2664_v49  ;;  %v1177_v50 = vmul.f32 %v2625_v41, %v1125_v59  ;;  %v904_v29 = vpop.f32.mrf.mxu1 }
 0x1be   :  { %1234 = vadd.xlane.f32.xlu2 %v1177_v50 }
 0x1bf   :  { %v1021_v26 = vpop.f32.mrf.mxu2 }
 0x1c0   :  { %v1022_v2 = vadd.f32 %v1021_v26, %v893_v32  ;;  %v778_v50 = vpop.f32.mrf.mxu0 }
 0x1c1   :  { %v779_v44 = vadd.f32 %v2520_v17, %v778_v50  ;;  %v774_v50 = vadd.f32 %v2520_v17, %v773_v28 }
 0x1c2   :  { %v1126_v34 = vmax.f32 %v1022_v2, 0.0 }
 0x1c4   :  { %v1178_v40 = vmul.f32 %v2625_v41, %v1126_v34  ;;  %v907_v26 = vpop.f32.mrf.mxu1 }
 0x1c5   :  { %v908_v2 = vadd.f32 %v907_v26, %v779_v44 }
 0x1c6   :  { %1236 = vadd.xlane.f32.xlu2 %v1178_v40 }
 0x1c7   :  { %v1023_v63 = vpop.f32.mrf.mxu2 }
 0x1c8   :  { %v1024_v49 = vadd.f32 %v1023_v63, %v895_v45  ;;  %v771_v45 = vadd.f32 %v2520_v17, %v770_v42  ;;  %v2677_v37 = vpop.f32.mrf.mxu0  ;;  %v2211_v63 = vld [vmem:[#allocation3 + $0x178] sm:$0xf0]  ;;  %v903_v42 = vadd.f32 %v902_v5, %v774_v50 }
 0x1c9   :  { %3332 = vst [vmem:[#allocation70_spill] sm:$0xff] %v2677_v37 }
 0x1ca   :  { %v1127_v59 = vmax.f32 %v1024_v49, 0.0  ;;  %v900_v14 = vadd.f32 %v899_v33, %v771_v45 }
 0x1cc   :  { %1065 = vmatmul.bf16.gmra.mxu2 %v2671_v11  ;;  %v1179_v32 = vmul.f32 %v2625_v41, %v1127_v59  ;;  %v2680_v38 = vpop.f32.mrf.mxu1 }
 0x1cd   :  { %3333 = vst [vmem:[#allocation71_spill] sm:$0xff] %v2680_v38 }
 0x1ce   :  { %1238 = vadd.xlane.f32.xlu2 %v1179_v32  ;;  %v2683_v32 = vor.u32 %v2211_v63, %v1970_v18 }
 0x1cf   :  { %v1026_v56 = vpop.f32.mrf.mxu2 }
 0x1d0   :  { %v1027_v34 = vadd.f32 %v1026_v56, %v898_v62  ;;  %3334 = vst [vmem:[#allocation72_spill] sm:$0xff] %v2683_v32  ;;  %v783_v44 = vpop.f32.mrf.mxu0 }
 0x1d1   :  { %v784_v26 = vadd.f32 %v2520_v17, %v783_v44 }
 0x1d2   :  { %v1128_v40 = vmax.f32 %v1027_v34, 0.0 }
 0x1d4   :  { %v1180_v49 = vmul.f32 %v2625_v41, %v1128_v40  ;;  %v912_v56 = vpop.f32.mrf.mxu1 }
 0x1d5   :  { %v913_v34 = vadd.f32 %v912_v56, %v784_v26 }
 0x1d6   :  { %1240 = vadd.xlane.f32.xlu1 %v1180_v49 }
 0x1d7   :  { %v1028_v20 = vpop.f32.mrf.mxu2 }
 0x1d8   :  { %v1029_v59 = vadd.f32 %v1028_v20, %v900_v14  ;;  %v776_v14 = vadd.f32 %v2520_v17, %v775_v21  ;;  %v2689_v28 = vpop.f32.mrf.mxu0  ;;  %v1982_v20 = vld [vmem:[#allocation3 + $0x188] sm:$0xf] }
 0x1da   :  { %v1129_v62 = vmax.f32 %v1029_v59, 0.0  ;;  %v905_v18 = vadd.f32 %v904_v29, %v776_v14  ;;  %v2214_v59 = vld [vmem:[#allocation3 + $0x190] sm:$0xf0] }
 0x1db   :  { %v2694_v44 = vor.u32 %v2214_v59, %v1982_v20  ;;  %v2217_v20 = vld [vmem:[#allocation3 + $0x1a8] sm:$0xf0] }
 0x1dc   :  { %1070 = vmatmul.bf16.gmra.mxu2 %v2683_v32  ;;  %v1181_v33 = vmul.f32 %v2625_v41, %v1129_v62  ;;  %v2692_v5 = vpop.f32.mrf.mxu1 }
 0x1dd   :  { %3335 = vst [vmem:[#allocation73_spill] sm:$0xff] %v2692_v5 }
 0x1de   :  { %1242 = vadd.xlane.f32.xlu1 %v1181_v33  ;;  %3336 = vst [vmem:[#allocation74_spill] sm:$0xff] %v2694_v44 }
 0x1df   :  { %v1031_v45 = vpop.f32.mrf.mxu2 }
 0x1e0   :  { %v1032_v40 = vadd.f32 %v1031_v45, %v903_v42  ;;  %v788_v26 = vpop.f32.mrf.mxu0 }
 0x1e1   :  { %v789_v42 = vadd.f32 %v2520_v17, %v788_v26  ;;  %v2220_v26 = vld [vmem:[#allocation3 + $0x1c0] sm:$0xf0] }
 0x1e2   :  { %v1130_v49 = vmax.f32 %v1032_v40, 0.0 }
 0x1e4   :  { %v1182_v63 = vmul.f32 %v2625_v41, %v1130_v49  ;;  %v917_v29 = vpop.f32.mrf.mxu1 }
 0x1e5   :  { %v918_v56 = vadd.f32 %v917_v29, %v789_v42 }
 0x1e6   :  { %1244 = vadd.xlane.f32.xlu0 %v1182_v63  ;;  %v1994_v63 = vld [vmem:[#allocation3 + $0x1a0] sm:$0xf] }
 0x1e7   :  { %v1033_v50 = vpop.f32.mrf.mxu2 }
 0x1e8   :  { %v1034_v62 = vadd.f32 %v1033_v50, %v905_v18  ;;  %v2709_v50 = vor.u32 %v2217_v20, %v1994_v63  ;;  %v2718_v29 = vpop.f32.mrf.mxu0 }
 0x1e9   :  { %v2701_v14 = vpop.xlane.xlu1 %1216 }
 0x1ea   :  { %v1131_v33 = vmax.f32 %v1034_v62, 0.0  ;;  %3339 = vst [vmem:[#allocation77_spill] sm:$0xff] %v2709_v50 }
 0x1ec   :  { %1075 = vmatmul.bf16.gmra.mxu2 %v2694_v44  ;;  %v1183_v21 = vmul.f32 %v2625_v41, %v1131_v33  ;;  %v2223_v44 = vld [vmem:[#allocation3 + $0x1d8] sm:$0xf0] }
 0x1ee   :  { %1246 = vadd.xlane.f32.xlu0 %v1183_v21 }
 0x1ef   :  { %v1036_v45 = vpop.f32.mrf.mxu2 }
 0x1f0   :  { %v2699_v40 = vadd.f32 %v1036_v45, %v908_v2  ;;  %v2006_v2 = vld [vmem:[#allocation3 + $0x1b8] sm:$0xf]  ;;  %v2721_v45 = vpop.f32.mrf.mxu1  ;;  %v793_v20 = vpop.f32.mrf.mxu0 }
 0x1f1   :  { %v2703_v49 = vpop.xlane.xlu2 %1218  ;;  %v2716_v42 = vor.u32 %v2220_v26, %v2006_v2  ;;  %v794_v32 = vadd.f32 %v2520_v17, %v793_v20 }
 0x1f2   :  { %3337 = vst [vmem:[#allocation75_spill] sm:$0xff] %v2699_v40 }
 0x1f3   :  { %3341 = vst [vmem:[#allocation79_spill] sm:$0xff] %v2716_v42 }
 0x1f7   :  { %v2707_v59 = vpop.f32.mrf.mxu2 }
 0x1f8   :  { %3338 = vst [vmem:[#allocation76_spill] sm:$0xff] %v2707_v59  ;;  %v795_v26 = vpop.f32.mrf.mxu0 }
 0x1f9   :  { %v796_v38 = vadd.f32 %v2520_v17, %v795_v26 }
 0x1fc   :  { %1080 = vmatmul.bf16.gmra.mxu2 %v2709_v50  ;;  %v2018_v50 = vld [vmem:[#allocation3 + $0x1d0] sm:$0xf] }
 0x1fd   :  { %v2728_v11 = vor.u32 %v2223_v44, %v2018_v50 }
 0x1ff   :  { %v1041_v62 = vpop.f32.mrf.mxu2 }
 0x200   :  { %v2712_v33 = vadd.f32 %v1041_v62, %v913_v34  ;;  %v922_v62 = vpop.f32.mrf.mxu1 }
 0x201   :  { %v923_v2 = vadd.f32 %v922_v62, %v794_v32  ;;  %v799_v32 = vadd.f32 %v2520_v17, %v2433_v7 }
 0x207   :  { %v2714_v21 = vpop.f32.mrf.mxu2 }
 0x208   :  { %3340 = vst [vmem:[#allocation78_spill] sm:$0xff] %v2714_v21  ;;  %v2226_v21 = vld [vmem:[#allocation3 + $0x1f0] sm:$0xf0] }
 0x20c   :  { %1085 = vmatmul.bf16.gmra.mxu2 %v2716_v42 }
 0x20f   :  { %v1046_v18 = vpop.f32.mrf.mxu2 }
 0x210   :  { %v2723_v63 = vadd.f32 %v1046_v18, %v918_v56  ;;  %v924_v56 = vpop.f32.mrf.mxu1 }
 0x211   :  { %v925_v37 = vadd.f32 %v924_v56, %v796_v38 }
 0x212   :  { %3342 = vst [vmem:[#allocation80_spill] sm:$0xff] %v2723_v63  ;;  %v2030_v63 = vld [vmem:[#allocation3 + $0x1e8] sm:$0xf] }
 0x213   :  { %v2733_v44 = vor.u32 %v2226_v21, %v2030_v63  ;;  %v2229_v21 = vld [vmem:[#allocation3 + $0x208] sm:$0xf0] }
 0x217   :  { %v2725_v34 = vpop.f32.mrf.mxu2 }
 0x21c   :  { %1090 = vmatmul.bf16.gmra.mxu2 %v2728_v11 }
 0x21f   :  { %v1051_v42 = vpop.f32.mrf.mxu2 }
 0x220   :  { %v1052_v59 = vadd.f32 %v1051_v42, %v923_v2 }
 0x222   :  { %v1138_v18 = vmax.f32 %v1052_v59, 0.0  ;;  %v928_v59 = vadd.f32 %v2435_v8, %v799_v32  ;;  %v804_v8 = vadd.f32 %v2520_v17, %v2447_v23  ;;  %v2750_v32 = vpop.xlane.xlu2 %1222 }
 0x224   :  { %v1190_v40 = vmul.f32 %v2625_v41, %v1138_v18  ;;  %v2746_v18 = vpop.xlane.xlu1 %1220 }
 0x226   :  { %1260 = vadd.xlane.f32.xlu0 %v1190_v40  ;;  %v801_v40 = vadd.f32 %v2520_v17, %v2437_v15 }
 0x227   :  { %v1053_v5 = vpop.f32.mrf.mxu2 }
 0x228   :  { %v1054_v20 = vadd.f32 %v1053_v5, %v925_v37  ;;  %v2042_v5 = vld [vmem:[#allocation3 + $0x200] sm:$0xf]  ;;  %v930_v7 = vadd.f32 %v2439_v16, %v801_v40 }
 0x229   :  { %v2744_v56 = vor.u32 %v2229_v21, %v2042_v5 }
 0x22a   :  { %v1139_v50 = vmax.f32 %v1054_v20, 0.0  ;;  %v2759_v40 = vpop.xlane.xlu2 %1226 }
 0x22c   :  { %1095 = vmatmul.bf16.gmra.mxu2 %v2733_v44  ;;  %v1191_v42 = vmul.f32 %v2625_v41, %v1139_v50  ;;  %v933_v50 = vadd.f32 %v2449_v24, %v804_v8 }
 0x22e   :  { %1262 = vadd.xlane.f32.xlu1 %v1191_v42 }
 0x22f   :  { %v1056_v38 = vpop.f32.mrf.mxu2 }
 0x230   :  { %v1057_v62 = vadd.f32 %v1056_v38, %v928_v59  ;;  %v2755_v59 = vpop.xlane.xlu1 %1224  ;;  %v806_v38 = vadd.f32 %v2520_v17, %v2451_v35 }
 0x232   :  { %v1140_v2 = vmax.f32 %v1057_v62, 0.0  ;;  %v935_v5 = vadd.f32 %v2453_v36, %v806_v38  ;;  %v1231_v35 = vpop.xlane.xlu2 %1230 }
 0x234   :  { %v1192_v37 = vmul.f32 %v2625_v41, %v1140_v2  ;;  %v2054_v2 = vld [vmem:[#allocation3 + $0x218] sm:$0xf] }
 0x236   :  { %1264 = vadd.xlane.f32.xlu0 %v1192_v37  ;;  %v2232_v37 = vld [vmem:[#allocation3 + $0x220] sm:$0xf0] }
 0x237   :  { %v1058_v63 = vpop.f32.mrf.mxu2 }
 0x238   :  { %v1059_v26 = vadd.f32 %v1058_v63, %v930_v7  ;;  %v2763_v7 = vor.u32 %v2232_v37, %v2054_v2  ;;  %v1229_v63 = vpop.xlane.xlu1 %1228  ;;  %v2235_v2 = vld [vmem:[#allocation3 + $0x238] sm:$0xf0] }
 0x23a   :  { %v1141_v20 = vmax.f32 %v1059_v26, 0.0  ;;  %v809_v26 = vadd.f32 %v2520_v17, %v2466_v52  ;;  %v2066_v52 = vld [vmem:[#allocation3 + $0x230] sm:$0xf] }
 0x23c   :  { %1100 = vmatmul.bf16.gmra.mxu2 %v2744_v56  ;;  %v1193_v15 = vmul.f32 %v2625_v41, %v1141_v20 }
 0x23e   :  { %1266 = vadd.xlane.f32.xlu1 %v1193_v15  ;;  %v938_v15 = vadd.f32 %v2468_v53, %v809_v26 }
 0x23f   :  { %v1061_v16 = vpop.f32.mrf.mxu2 }
 0x240   :  { %v1062_v42 = vadd.f32 %v1061_v16, %v933_v50  ;;  %v1233_v16 = vpop.xlane.xlu1 %1232 }
 0x242   :  { %v1142_v62 = vmax.f32 %v1062_v42, 0.0  ;;  %v811_v42 = vadd.f32 %v2520_v17, %v2471_v60 }
 0x244   :  { %v1194_v23 = vmul.f32 %v2625_v41, %v1142_v62  ;;  %v1235_v62 = vpop.xlane.xlu2 %1234  ;;  %v940_v37 = vadd.f32 %v2473_v61, %v811_v42 }
 0x246   :  { %1268 = vadd.xlane.f32.xlu0 %v1194_v23 }
 0x247   :  { %v1063_v21 = vpop.f32.mrf.mxu2 }
 0x248   :  { %v1064_v24 = vadd.f32 %v1063_v21, %v935_v5 }
 0x249   :  { %v1241_v53 = vpop.xlane.xlu1 %1240 }
 0x24a   :  { %v1143_v8 = vmax.f32 %v1064_v24, 0.0  ;;  %v2774_v24 = vor.u32 %v2235_v2, %v2066_v52 }
 0x24c   :  { %1105 = vmatmul.bf16.gmra.mxu2 %v2763_v7  ;;  %v1195_v20 = vmul.f32 %v2625_v41, %v1143_v8  ;;  %v814_v8 = vadd.f32 %v2520_v17, %v2486_v12  ;;  %v791_v12 = vadd.f32 %v2520_v17, %v2718_v29 }
 0x24e   :  { %1270 = vadd.xlane.f32.xlu1 %v1195_v20 }
 0x24f   :  { %v1066_v50 = vpop.f32.mrf.mxu2 }
 0x250   :  { %v1067_v36 = vadd.f32 %v1066_v50, %v938_v15  ;;  %v1237_v15 = vpop.xlane.xlu2 %1236  ;;  %v943_v50 = vadd.f32 %v2488_v13, %v814_v8 }
 0x251   :  { %v1243_v2 = vpop.xlane.xlu1 %1242 }
 0x252   :  { %v1144_v38 = vmax.f32 %v1067_v36, 0.0 }
 0x254   :  { %v1196_v23 = vmul.f32 %v2625_v41, %v1144_v38  ;;  %v816_v38 = vadd.f32 %v2520_v17, %v2491_v22 }
 0x256   :  { %1272 = vadd.xlane.f32.xlu0 %v1196_v23 }
 0x257   :  { %v1068_v5 = vpop.f32.mrf.mxu2 }
 0x258   :  { %v1069_v21 = vadd.f32 %v1068_v5, %v940_v37  ;;  %v945_v5 = vadd.f32 %v2493_v25, %v816_v38  ;;  %v1239_v13 = vpop.xlane.xlu2 %1238  ;;  %v821_v25 = vadd.f32 %v2520_v17, %v2508_v55 }
 0x259   :  { %v1245_v26 = vpop.xlane.xlu0 %1244  ;;  %v1317_v22 = vpack.c.bf16 %v1239_v13, %v1237_v15 }
 0x25a   :  { %v1145_v20 = vmax.f32 %v1069_v21, 0.0  ;;  %v1318_v21 = vpack.c.bf16 %v1243_v2, %v1241_v53  ;;  %v1315_v53 = vpack.c.bf16 %v1231_v35, %v1229_v63  ;;  %v950_v15 = vadd.f32 %v2510_v58, %v821_v25  ;;  %v959_v63 = vpop.f32.mrf.mxu3 }
 0x25c   :  { %1110 = vmatmul.bf16.gmra.mxu2 %v2774_v24  ;;  %v1197_v60 = vmul.f32 %v2625_v41, %v1145_v20  ;;  %v920_v20 = vadd.f32 %v2721_v45, %v791_v12 }
 0x25e   :  { %1274 = vadd.xlane.f32.xlu1 %v1197_v60 }
 0x25f   :  { %v1071_v61 = vpop.f32.mrf.mxu2 }
 0x260   :  { %v1072_v36 = vadd.f32 %v1071_v61, %v943_v50  ;;  %v1316_v61 = vpack.c.bf16 %v1235_v62, %v1233_v16  ;;  %v1134_v16 = vmax.f32 %v2712_v33, 0.0  ;;  %v826_v33 = vadd.f32 %v2520_v17, %v2529_v3 }
 0x261   :  { %v1247_v42 = vpop.xlane.xlu0 %1246 }
 0x262   :  { %v1146_v23 = vmax.f32 %v1072_v36, 0.0  ;;  %v1319_v52 = vpack.c.bf16 %v1247_v42, %v1245_v26  ;;  %v1049_v26 = vadd.f32 %v2725_v34, %v920_v20  ;;  %v1314_v34 = vpack.c.bf16 %v2759_v40, %v2755_v59 }
 0x263   :  { %v1186_v55 = vmul.f32 %v2625_v41, %v1134_v16  ;;  %v3343_v59 = vpack.c.bf16 %v2703_v49, %v2701_v14 }
 0x264   :  { %1338 = vmatpush.bf16.msrb.mxu3 %v1319_v52  ;;  %v1198_v37 = vmul.f32 %v2625_v41, %v1146_v23  ;;  %v1137_v42 = vmax.f32 %v1049_v26, 0.0  ;;  %v1313_v23 = vpack.c.bf16 %v2750_v32, %v2746_v18  ;;  %v819_v18 = vadd.f32 %v2520_v17, %v2503_v43  ;;  %v962_v52 = vpop.f32.mrf.mxu3 }
 0x265   :  { %v955_v32 = vadd.f32 %v2531_v1, %v826_v33 }
 0x266   :  { %1276 = vadd.xlane.f32.xlu0 %v1198_v37  ;;  %v1189_v45 = vmul.f32 %v2625_v41, %v1137_v42 }
 0x267   :  { %v1073_v8 = vpop.f32.mrf.mxu2 }
 0x268   :  { %v1074_v60 = vadd.f32 %v1073_v8, %v945_v5  ;;  %1339 = vmatpush.bf16.msrb.mxu3 %v1318_v21  ;;  %v834_v8 = vadd.f32 %v2520_v17, %v2555_v57  ;;  %v839_v57 = vadd.f32 %v2520_v17, %v2568_v30 }
 0x26a   :  { %v1147_v50 = vmax.f32 %v1074_v60, 0.0  ;;  %v963_v60 = vadd.f32 %v962_v52, %v834_v8 }
 0x26c   :  { %1340 = vmatpush.bf16.msrb.mxu3 %v1317_v22  ;;  %v1199_v29 = vmul.f32 %v2625_v41, %v1147_v50  ;;  %v964_v43 = vpop.f32.mrf.mxu3 }
 0x26e   :  { %1278 = vadd.xlane.f32.xlu1 %v1199_v29 }
 0x26f   :  { %v1076_v36 = vpop.f32.mrf.mxu2 }
 0x270   :  { %1341 = vmatpush.bf16.msrb.mxu3 %v1316_v61 }
 0x274   :  { %1342 = vmatpush.bf16.msrb.mxu3 %v1315_v53  ;;  %v967_v20 = vpop.f32.mrf.mxu3 }
 0x275   :  { %v968_v53 = vadd.f32 %v967_v20, %v839_v57  ;;  %v3344_v20 = vld [vmem:[#allocation53_spill] sm:$0xff] }
 0x276   :  { %1258 = vadd.xlane.f32.xlu1 %v1189_v45 }
 0x277   :  { %v1078_v38 = vpop.f32.mrf.mxu2 }
 0x278   :  { %v2797_v62 = vadd.f32 %v1078_v38, %v950_v15  ;;  %1343 = vmatpush.bf16.msrb.mxu3 %v1314_v34 }
 0x27c   :  { %1344 = vmatpush.bf16.msrb.mxu3 %v1313_v23  ;;  %v969_v29 = vpop.f32.mrf.mxu3 }
 0x27e   :  { %1252 = vadd.xlane.f32.xlu1 %v1186_v55 }
 0x27f   :  { %v1081_v35 = vpop.f32.mrf.mxu2 }
 0x280   :  { %v2803_v58 = vadd.f32 %v1081_v35, %v2527_v48  ;;  %1345 = vmatpush.bf16.msrb.mxu3 %v3343_v59  ;;  %v948_v48 = vadd.f32 %v2505_v47, %v819_v18 }
 0x282   :  { %v1077_v37 = vadd.f32 %v1076_v36, %v948_v48 }
 0x283   :  { %1346 = vmatmul.bf16.vlgmr.msrb.gmra.mxu3 %v2461_v46  ;;  %v831_v46 = vadd.f32 %v2520_v17, %v2545_v0  ;;  %v836_v0 = vadd.f32 %v2520_v17, %v2558_v51 }
 0x284   :  { %v1148_v5 = vmax.f32 %v1077_v37, 0.0  ;;  %v972_v51 = vpop.f32.mrf.mxu3 }
 0x285   :  { %v960_v21 = vadd.f32 %v959_v63, %v831_v46  ;;  %v965_v26 = vadd.f32 %v964_v43, %v836_v0 }
 0x286   :  { %v1200_v1 = vmul.f32 %v2625_v41, %v1148_v5 }
 0x287   :  { %v1083_v40 = vpop.f32.mrf.mxu2 }
 0x288   :  { %v1084_v2 = vadd.f32 %v1083_v40, %v955_v32 }
 0x28a   :  { %v1151_v12 = vmax.f32 %v1084_v2, 0.0 }
 0x28c   :  { %v1203_v14 = vmul.f32 %v2625_v41, %v1151_v12  ;;  %v974_v63 = vpop.f32.mrf.mxu3 }
 0x28e   :  { %1286 = vadd.xlane.f32.xlu1 %v1203_v14 }
 0x28f   :  { %v1086_v49 = vpop.f32.mrf.mxu2 }
 0x290   :  { %v2817_v3 = vadd.f32 %v1086_v49, %v2543_v54 }
 0x293   :  { %1351 = vmatmul.bf16.gmra.mxu3 %v2481_v6 }
 0x294   :  { %v977_v2 = vpop.f32.mrf.mxu3 }
 0x296   :  { %1280 = vadd.xlane.f32.xlu1 %v1200_v1 }
 0x297   :  { %v1088_v47 = vpop.f32.mrf.mxu2 }
 0x298   :  { %v2823_v13 = vadd.f32 %v1088_v47, %v960_v21 }
 0x299   :  { %v2846_v32 = vpop.xlane.xlu0 %1260 }
 0x29f   :  { %v1091_v54 = vpop.f32.mrf.mxu2 }
 0x2a0   :  { %v1092_v22 = vadd.f32 %v1091_v54, %v963_v60 }
 0x2a2   :  { %v1154_v50 = vmax.f32 %v1092_v22, 0.0  ;;  %v3345_v22 = vld [vmem:[#allocation42_spill] sm:$0xff] }
 0x2a3   :  { %1356 = vmatmul.bf16.gmra.mxu3 %v2498_v31  ;;  %v2837_v31 = vld [vmem:[%s3205_s2] ss:$0 sm:$0xff] }
 0x2a4   :  { %v1206_v6 = vmul.f32 %v2625_v41, %v1154_v50  ;;  %v841_v34 = vadd.f32 %v2837_v31, %v2571_v39  ;;  %v844_v55 = vadd.f32 %v2837_v31, %v2581_v19  ;;  %v846_v40 = vadd.f32 %v2837_v31, %v2584_v27  ;;  %v979_v27 = vpop.f32.mrf.mxu3 }
 0x2a5   :  { %v849_v5 = vadd.f32 %v2837_v31, %v2594_v4  ;;  %v851_v60 = vadd.f32 %v2837_v31, %v3344_v20  ;;  %v3354_v20 = vld [vmem:[#allocation70_spill] sm:$0xff] }
 0x2a6   :  { %1292 = vadd.xlane.f32.xlu2 %v1206_v6  ;;  %v970_v30 = vadd.f32 %v969_v29, %v841_v34  ;;  %v973_v33 = vadd.f32 %v972_v51, %v844_v55  ;;  %v975_v48 = vadd.f32 %v974_v63, %v846_v40  ;;  %v3348_v55 = vld [vmem:[#allocation45_spill] sm:$0xff]  ;;  %v786_v63 = vadd.f32 %v2837_v31, %v2689_v28 }
 0x2a7   :  { %v1093_v61 = vpop.f32.mrf.mxu2  ;;  %v978_v1 = vadd.f32 %v977_v2, %v849_v5  ;;  %v980_v50 = vadd.f32 %v979_v27, %v851_v60  ;;  %v781_v60 = vadd.f32 %v2837_v31, %v3354_v20  ;;  %v3369_v20 = vld [vmem:[#allocation44_spill] sm:$0xff] }
 0x2a8   :  { %v1094_v36 = vadd.f32 %v1093_v61, %v965_v26 }
 0x2a9   :  { %v1265_v14 = vpop.xlane.xlu0 %1264 }
 0x2aa   :  { %v1155_v42 = vmax.f32 %v1094_v36, 0.0  ;;  %v3346_v36 = vld [vmem:[#allocation57_spill] sm:$0xff] }
 0x2ab   :  { %v854_v57 = vadd.f32 %v2837_v31, %v3346_v36  ;;  %v3358_v36 = vld [vmem:[#allocation55_spill] sm:$0xff] }
 0x2ac   :  { %v1207_v25 = vmul.f32 %v2625_v41, %v1155_v42  ;;  %v982_v6 = vpop.f32.mrf.mxu3 }
 0x2ae   :  { %1294 = vadd.xlane.f32.xlu0 %v1207_v25 }
 0x2af   :  { %v1096_v45 = vpop.f32.mrf.mxu2 }
 0x2b0   :  { %v1097_v15 = vadd.f32 %v1096_v45, %v968_v53  ;;  %v983_v53 = vadd.f32 %v982_v6, %v854_v57  ;;  %v3357_v6 = vld [vmem:[#allocation76_spill] sm:$0xff] }
 0x2b1   :  { %v3359_v57 = vld [vmem:[#allocation60_spill] sm:$0xff] }
 0x2b2   :  { %v1156_v38 = vmax.f32 %v1097_v15, 0.0 }
 0x2b3   :  { %1361 = vmatmul.bf16.gmra.mxu3 %v2515_v9  ;;  %v2848_v9 = vpop.xlane.xlu1 %1262 }
 0x2b4   :  { %v1208_v17 = vmul.f32 %v2625_v41, %v1156_v38  ;;  %v3347_v38 = vld [vmem:[#allocation58_spill] sm:$0xff] }
 0x2b6   :  { %1296 = vadd.xlane.f32.xlu2 %v1208_v17  ;;  %v856_v17 = vadd.f32 %v2837_v31, %v3347_v38 }
 0x2b7   :  { %v1098_v16 = vpop.f32.mrf.mxu2 }
 0x2b8   :  { %v1099_v23 = vadd.f32 %v1098_v16, %v970_v30 }
 0x2b9   :  { %v1269_v47 = vpop.xlane.xlu0 %1268 }
 0x2ba   :  { %v1157_v35 = vmax.f32 %v1099_v23, 0.0  ;;  %v984_v23 = vpop.f32.mrf.mxu3 }
 0x2bb   :  { %v1267_v49 = vpop.xlane.xlu1 %1266 }
 0x2bc   :  { %v1209_v59 = vmul.f32 %v2625_v41, %v1157_v35 }
 0x2be   :  { %1298 = vadd.xlane.f32.xlu0 %v1209_v59  ;;  %v985_v59 = vadd.f32 %v984_v23, %v856_v17 }
 0x2bf   :  { %v1101_v18 = vpop.f32.mrf.mxu2 }
 0x2c0   :  { %v1102_v39 = vadd.f32 %v1101_v18, %v973_v33 }
 0x2c2   :  { %v1158_v52 = vmax.f32 %v1102_v39, 0.0  ;;  %v3349_v39 = vld [vmem:[#allocation73_spill] sm:$0xff] }
 0x2c3   :  { %1366 = vmatmul.bf16.gmra.mxu3 %v2536_v10  ;;  %v1271_v8 = vpop.xlane.xlu1 %1270  ;;  %v915_v40 = vadd.f32 %v3349_v39, %v786_v63 }
 0x2c4   :  { %v1210_v19 = vmul.f32 %v2625_v41, %v1158_v52  ;;  %v1152_v52 = vmax.f32 %v2817_v3, 0.0  ;;  %v1323_v3 = vpack.c.bf16 %v2848_v9, %v2846_v32  ;;  %v3355_v9 = vld [vmem:[#allocation71_spill] sm:$0xff] }
 0x2c6   :  { %1300 = vadd.xlane.f32.xlu2 %v1210_v19  ;;  %v1325_v19 = vpack.c.bf16 %v1271_v8, %v1269_v47  ;;  %v1204_v5 = vmul.f32 %v2625_v41, %v1152_v52  ;;  %v3353_v8 = vld [vmem:[#allocation75_spill] sm:$0xff] }
 0x2c7   :  { %v1103_v12 = vpop.f32.mrf.mxu2 }
 0x2c8   :  { %v1104_v37 = vadd.f32 %v1103_v12, %v975_v48  ;;  %v3350_v12 = vld [vmem:[#allocation78_spill] sm:$0xff] }
 0x2c9   :  { %v1273_v29 = vpop.xlane.xlu0 %1272 }
 0x2ca   :  { %v1159_v46 = vmax.f32 %v1104_v37, 0.0  ;;  %v1044_v37 = vadd.f32 %v3350_v12, %v915_v40 }
 0x2cc   :  { %v1211_v43 = vmul.f32 %v2625_v41, %v1159_v46  ;;  %v1324_v46 = vpack.c.bf16 %v1267_v49, %v1265_v14  ;;  %v1132_v14 = vmax.f32 %v3353_v8, 0.0  ;;  %v1153_v49 = vmax.f32 %v2823_v13, 0.0  ;;  %v3366_v8 = vld [vmem:[#allocation36_spill] sm:$0xff] }
 0x2ce   :  { %1302 = vadd.xlane.f32.xlu0 %v1211_v43  ;;  %v1135_v43 = vmax.f32 %v1044_v37, 0.0  ;;  %v1184_v32 = vmul.f32 %v2625_v41, %v1132_v14  ;;  %v3367_v14 = vld [vmem:[#allocation41_spill] sm:$0xff] }
 0x2cf   :  { %v1106_v21 = vpop.f32.mrf.mxu2 }
 0x2d0   :  { %v1107_v10 = vadd.f32 %v1106_v21, %v978_v1  ;;  %v3351_v1 = vld [vmem:[#allocation80_spill] sm:$0xff]  ;;  %v1187_v47 = vmul.f32 %v2625_v41, %v1135_v43 }
 0x2d1   :  { %v1275_v61 = vpop.xlane.xlu1 %1274  ;;  %v1136_v27 = vmax.f32 %v3351_v1, 0.0  ;;  %v3352_v21 = vld [vmem:[#allocation48_spill] sm:$0xff] }
 0x2d2   :  { %v1160_v54 = vmax.f32 %v1107_v10, 0.0  ;;  %v1326_v33 = vpack.c.bf16 %v1275_v61, %v1273_v29 }
 0x2d3   :  { %1371 = vmatmul.bf16.gmra.mxu3 %v3345_v22  ;;  %v1188_v10 = vmul.f32 %v2625_v41, %v1136_v27  ;;  %v910_v22 = vadd.f32 %v3355_v9, %v781_v60  ;;  %v3361_v27 = vld [vmem:[#allocation35_spill] sm:$0xff]  ;;  %v3370_v60 = vld [vmem:[#allocation40_spill] sm:$0xff] }
 0x2d4   :  { %v1212_v0 = vmul.f32 %v2625_v41, %v1160_v54  ;;  %v1205_v54 = vmul.f32 %v2625_v41, %v1153_v49  ;;  %v3368_v49 = vld [vmem:[#allocation38_spill] sm:$0xff] }
 0x2d6   :  { %1304 = vadd.xlane.f32.xlu2 %v1212_v0  ;;  %v1149_v0 = vmax.f32 %v2797_v62, 0.0  ;;  %v3360_v62 = vld [vmem:[#allocation63_spill] sm:$0xff] }
 0x2d7   :  { %v1108_v4 = vpop.f32.mrf.mxu2 }
 0x2d8   :  { %v1109_v26 = vadd.f32 %v1108_v4, %v980_v50  ;;  %v1150_v50 = vmax.f32 %v2803_v58, 0.0  ;;  %v3356_v4 = vld [vmem:[#allocation51_spill] sm:$0xff]  ;;  %v1201_v31 = vmul.f32 %v2625_v41, %v1149_v0  ;;  %v3373_v0 = vld [vmem:[#allocation9_spill] sm:$0xff] }
 0x2d9   :  { %v1277_v15 = vpop.xlane.xlu0 %1276 }
 0x2da   :  { %v1161_v42 = vmax.f32 %v1109_v26, 0.0  ;;  %v1039_v26 = vadd.f32 %v3357_v6, %v910_v22  ;;  %v1202_v13 = vmul.f32 %v2625_v41, %v1150_v50  ;;  %v3374_v50 = vld [vmem:[#allocation50_spill] sm:$0xff] }
 0x2dc   :  { %v1213_v25 = vmul.f32 %v2625_v41, %v1161_v42  ;;  %v1133_v29 = vmax.f32 %v1039_v26, 0.0 }
 0x2de   :  { %1306 = vadd.xlane.f32.xlu0 %v1213_v25  ;;  %v1185_v61 = vmul.f32 %v2625_v41, %v1133_v29  ;;  %v3378_v29 = vld [vmem:[#allocation49_spill] sm:$0xff] }
 0x2df   :  { %v1111_v45 = vpop.f32.mrf.mxu2 }
 0x2e0   :  { %v1112_v51 = vadd.f32 %v1111_v45, %v983_v53 }
 0x2e1   :  { %v1279_v34 = vpop.xlane.xlu1 %1278 }
 0x2e2   :  { %v1162_v30 = vmax.f32 %v1112_v51, 0.0  ;;  %v1327_v16 = vpack.c.bf16 %v1279_v34, %v1277_v15 }
 0x2e3   :  { %1376 = vmatmul.bf16.gmra.mxu3 %v3348_v55 }
 0x2e4   :  { %1467 = vmatpush.bf16.msrb.mxu0 %v1327_v16  ;;  %v1214_v35 = vmul.f32 %v2625_v41, %v1162_v30 }
 0x2e6   :  { %1308 = vadd.xlane.f32.xlu2 %v1214_v35 }
 0x2e7   :  { %v1113_v18 = vpop.f32.mrf.mxu2 }
 0x2e8   :  { %v1114_v2 = vadd.f32 %v1113_v18, %v985_v59  ;;  %1468 = vmatpush.bf16.msrb.mxu0 %v1326_v33 }
 0x2e9   :  { %v1259_v17 = vpop.xlane.xlu1 %1258 }
 0x2ea   :  { %v1163_v48 = vmax.f32 %v1114_v2, 0.0 }
 0x2ec   :  { %1469 = vmatpush.bf16.msrb.mxu0 %v1325_v19  ;;  %v1215_v28 = vmul.f32 %v2625_v41, %v1163_v48 }
 0x2ee   :  { %1310 = vadd.xlane.f32.xlu0 %v1215_v28  ;;  %1288 = vadd.xlane.f32.xlu2 %v1204_v5 }
 0x2f0   :  { %1470 = vmatpush.bf16.msrb.mxu0 %v1324_v46 }
 0x2f1   :  { %v1253_v33 = vpop.xlane.xlu1 %1252 }
 0x2f3   :  { %1381 = vmatmul.bf16.gmra.mxu3 %v3352_v21  ;;  %v3363_v21 = vld [vmem:[#allocation37_spill] sm:$0xff] }
 0x2f4   :  { %1471 = vmatpush.bf16.msrb.mxu0 %v1323_v3  ;;  %v3362_v3 = vld [vmem:[#allocation31_spill] sm:$0xff] }
 0x2f6   :  { %1256 = vadd.xlane.f32.xlu0 %v1188_v10  ;;  %1254 = vadd.xlane.f32.xlu2 %v1187_v47  ;;  %v3364_v10 = vld [vmem:[#allocation34_spill] sm:$0xff]  ;;  %v3365_v47 = vld [vmem:[#allocation39_spill] sm:$0xff] }
 0x2fe   :  { %1290 = vadd.xlane.f32.xlu0 %v1205_v54  ;;  %1248 = vadd.xlane.f32.xlu2 %v1184_v32  ;;  %v3371_v54 = vld [vmem:[#allocation47_spill] sm:$0xff] }
 0x2ff   :  { %v3372_v32 = vld [vmem:[#allocation43_spill] sm:$0xff] }
 0x301   :  { %v1287_v19 = vpop.xlane.xlu1 %1286 }
 0x303   :  { %1386 = vmatmul.bf16.gmra.mxu3 %v3356_v4  ;;  %v3375_v4 = vld [vmem:[#allocation46_spill] sm:$0xff] }
 0x306   :  { %1284 = vadd.xlane.f32.xlu0 %v1202_v13  ;;  %1282 = vadd.xlane.f32.xlu2 %v1201_v31  ;;  %v1347_v9 = vpop.f32.mrf.mxu3  ;;  %v3376_v13 = vld [vmem:[#allocation11_spill] sm:$0xff]  ;;  %v3377_v31 = vld [vmem:[#allocation54_spill] sm:$0xff] }
 0x309   :  { %v1281_v5 = vpop.xlane.xlu1 %1280 }
 0x30e   :  { %1250 = vadd.xlane.f32.xlu0 %v1185_v61  ;;  %v1349_v22 = vpop.f32.mrf.mxu3 }
 0x313   :  { %1391 = vmatmul.bf16.gmra.mxu3 %v3358_v36  ;;  %v2919_v36 = vstv %s3207_s4 }
 0x316   :  { %v1352_v6 = vpop.f32.mrf.mxu3 }
 0x319   :  { %v1293_v58 = vpop.xlane.xlu2 %1292 }
 0x31e   :  { %v1354_v26 = vpop.f32.mrf.mxu3 }
 0x321   :  { %v1295_v42 = vpop.xlane.xlu0 %1294 }
 0x322   :  { %v1331_v2 = vpack.c.bf16 %v1295_v42, %v1293_v58  ;;  %v3379_v42 = vld [vmem:[#allocation13_spill] sm:$0xff] }
 0x323   :  { %1396 = vmatmul.bf16.gmra.mxu3 %v3359_v57 }
 0x326   :  { %v1357_v61 = vpop.f32.mrf.mxu3 }
 0x329   :  { %v1297_v25 = vpop.xlane.xlu2 %1296 }
 0x32e   :  { %v1359_v58 = vpop.f32.mrf.mxu3 }
 0x331   :  { %v1299_v53 = vpop.xlane.xlu0 %1298 }
 0x332   :  { %v1332_v18 = vpack.c.bf16 %v1299_v53, %v1297_v25  ;;  %v3380_v25 = vld [vmem:[#allocation59_spill] sm:$0xff] }
 0x333   :  { %1401 = vmatmul.bf16.gmra.mxu3 %v3360_v62  ;;  %v1348_v62 = vadd.f32 %v1347_v9, %v2919_v36 }
 0x339   :  { %v1301_v45 = vpop.xlane.xlu2 %1300 }
 0x341   :  { %v1303_v51 = vpop.xlane.xlu0 %1302 }
 0x342   :  { %v1333_v35 = vpack.c.bf16 %v1303_v51, %v1301_v45 }
 0x343   :  { %1406 = vmatmul.bf16.gmra.mxu3 %v3373_v0  ;;  %v3389_v0 = vld [vmem:[#allocation66_spill] sm:$0xff] }
 0x349   :  { %v1305_v15 = vpop.xlane.xlu2 %1304 }
 0x351   :  { %v1307_v34 = vpop.xlane.xlu0 %1306 }
 0x352   :  { %v1334_v23 = vpack.c.bf16 %v1307_v34, %v1305_v15  ;;  %v3381_v15 = vld [vmem:[#allocation52_spill] sm:$0xff] }
 0x353   :  { %1411 = vmatmul.bf16.gmra.mxu3 %v3376_v13 }
 0x359   :  { %v1309_v38 = vpop.xlane.xlu2 %1308 }
 0x361   :  { %v1311_v30 = vpop.xlane.xlu0 %1310  ;;  %v1289_v16 = vpop.xlane.xlu2 %1288 }
 0x362   :  { %v1335_v41 = vpack.c.bf16 %v1311_v30, %v1309_v38  ;;  %v1362_v38 = vpop.f32.mrf.mxu3 }
 0x363   :  { %1416 = vmatmul.bf16.gmra.mxu3 %v3379_v42 }
 0x364   :  { %1596 = vmatpush.bf16.msrb.mxu1 %v1335_v41 }
 0x368   :  { %1597 = vmatpush.bf16.msrb.mxu1 %v1334_v23 }
 0x369   :  { %v1257_v55 = vpop.xlane.xlu0 %1256  ;;  %v1255_v63 = vpop.xlane.xlu2 %1254 }
 0x36a   :  { %v1322_v59 = vpack.c.bf16 %v1259_v17, %v1257_v55  ;;  %v1321_v39 = vpack.c.bf16 %v1255_v63, %v1253_v33  ;;  %v1350_v17 = vadd.f32 %v1349_v22, %v2919_v36  ;;  %v1353_v55 = vadd.f32 %v1352_v6, %v2919_v36  ;;  %v1364_v63 = vpop.f32.mrf.mxu3  ;;  %v3388_v22 = vld [vmem:[#allocation19_spill] sm:$0xff] }
 0x36c   :  { %1472 = vmatpush.bf16.msrb.mxu0 %v1322_v59  ;;  %1598 = vmatpush.bf16.msrb.mxu1 %v1333_v35  ;;  %v3382_v35 = vld [vmem:[#allocation15_spill] sm:$0xff]  ;;  %v3383_v59 = vld [vmem:[#allocation62_spill] sm:$0xff] }
 0x370   :  { %1473 = vmatpush.bf16.msrb.mxu0 %v1321_v39  ;;  %1599 = vmatpush.bf16.msrb.mxu1 %v1332_v18 }
 0x371   :  { %v1291_v40 = vpop.xlane.xlu0 %1290  ;;  %v1249_v52 = vpop.xlane.xlu2 %1248 }
 0x372   :  { %v1330_v48 = vpack.c.bf16 %v1291_v40, %v1289_v16  ;;  %v3384_v40 = vld [vmem:[#allocation56_spill] sm:$0xff] }
 0x373   :  { %1421 = vmatmul.bf16.gmra.mxu3 %v3382_v35 }
 0x374   :  { %1600 = vmatpush.bf16.msrb.mxu1 %v1331_v2  ;;  %v1367_v2 = vpop.f32.mrf.mxu3 }
 0x375   :  { %v1368_v42 = vadd.f32 %v1367_v2, %v2919_v36  ;;  %v3396_v2 = vld [vmem:[#allocation12_spill] sm:$0xff] }
 0x378   :  { %1601 = vmatpush.bf16.msrb.mxu1 %v1330_v48 }
 0x379   :  { %v1285_v12 = vpop.xlane.xlu0 %1284  ;;  %v1283_v28 = vpop.xlane.xlu2 %1282 }
 0x37a   :  { %v1329_v37 = vpack.c.bf16 %v1287_v19, %v1285_v12  ;;  %v1328_v46 = vpack.c.bf16 %v1283_v28, %v1281_v5  ;;  %v1355_v19 = vadd.f32 %v1354_v26, %v2919_v36  ;;  %v1358_v5 = vadd.f32 %v1357_v61, %v2919_v36  ;;  %v3390_v26 = vld [vmem:[#allocation64_spill] sm:$0xff] }
 0x37c   :  { %1602 = vmatpush.bf16.msrb.mxu1 %v1329_v37 }
 0x380   :  { %1603 = vmatpush.bf16.msrb.mxu1 %v1328_v46  ;;  %v1369_v46 = vpop.f32.mrf.mxu3 }
 0x381   :  { %v1251_v43 = vpop.xlane.xlu0 %1250 }
 0x382   :  { %v1320_v1 = vpack.c.bf16 %v1251_v43, %v1249_v52  ;;  %v3385_v43 = vld [vmem:[#allocation17_spill] sm:$0xff] }
 0x383   :  { %1604 = vmatmul.bf16.vlgmr.msrb.gmra.mxu1 %v3361_v27  ;;  %1426 = vmatmul.bf16.gmra.mxu3 %v3385_v43 }
 0x384   :  { %1474 = vmatpush.bf16.msrb.mxu0 %v1320_v1  ;;  %v3386_v1 = vld [vmem:[#allocation65_spill] sm:$0xff] }
 0x387   :  { %1475 = vmatmul.bf16.vlgmr.msrb.gmra.mxu0 %v3362_v3 }
 0x393   :  { %1609 = vmatmul.bf16.gmra.mxu1 %v3363_v21 }
 0x397   :  { %1480 = vmatmul.bf16.gmra.mxu0 %v3364_v10  ;;  %v3387_v10 = vld [vmem:[#allocation61_spill] sm:$0xff] }
 0x3a3   :  { %1614 = vmatmul.bf16.gmra.mxu1 %v3365_v47 }
 0x3a7   :  { %1485 = vmatmul.bf16.gmra.mxu0 %v3366_v8  ;;  %v1372_v8 = vpop.f32.mrf.mxu3 }
 0x3a8   :  { %v1373_v35 = vadd.f32 %v1372_v8, %v2919_v36  ;;  %v3399_v8 = vld [vmem:[#allocation14_spill] sm:$0xff] }
 0x3af   :  { %v1374_v9 = vpop.f32.mrf.mxu3  ;;  %1431 = vmatmul.bf16.gmra.mxu3 %v3388_v22 }
 0x3b3   :  { %1619 = vmatmul.bf16.gmra.mxu1 %v3367_v14  ;;  %v1360_v14 = vadd.f32 %v1359_v58, %v2919_v36 }
 0x3b7   :  { %1490 = vmatmul.bf16.gmra.mxu0 %v3368_v49 }
 0x3c3   :  { %1624 = vmatmul.bf16.gmra.mxu1 %v3369_v20 }
 0x3c7   :  { %1495 = vmatmul.bf16.gmra.mxu0 %v3370_v60 }
 0x3d3   :  { %1629 = vmatmul.bf16.gmra.mxu1 %v3371_v54 }
 0x3d7   :  { %1500 = vmatmul.bf16.gmra.mxu0 %v3372_v32  ;;  %v1363_v32 = vadd.f32 %v1362_v38, %v2919_v36  ;;  %v3393_v38 = vld [vmem:[#allocation10_spill] sm:$0xff] }
 0x3e3   :  { %1634 = vmatmul.bf16.gmra.mxu1 %v3374_v50 }
 0x3e7   :  { %1505 = vmatmul.bf16.gmra.mxu0 %v3375_v4 }
 0x3f3   :  { %1639 = vmatmul.bf16.gmra.mxu1 %v3377_v31  ;;  %v1377_v31 = vpop.f32.mrf.mxu3 }
 0x3f4   :  { %v1378_v43 = vadd.f32 %v1377_v31, %v2919_v36  ;;  %v3402_v31 = vld [vmem:[#allocation16_spill] sm:$0xff] }
 0x3f7   :  { %1510 = vmatmul.bf16.gmra.mxu0 %v3378_v29  ;;  %v1365_v29 = vadd.f32 %v1364_v63, %v2919_v36 }
 0x400   :  { %v1605_v57 = vpop.f32.mrf.mxu1 }
 0x403   :  { %1644 = vmatmul.bf16.gmra.mxu1 %v3380_v25  ;;  %v1379_v25 = vpop.f32.mrf.mxu3 }
 0x404   :  { %v1476_v53 = vpop.f32.mrf.mxu0 }
 0x405   :  { %v1477_v45 = vadd.f32 %v1476_v53, %v1348_v62  ;;  %v3391_v53 = vld [vmem:[#allocation21_spill] sm:$0xff] }
 0x406   :  { %1436 = vmatmul.bf16.gmra.mxu3 %v3391_v53 }
 0x407   :  { %v1606_v51 = vadd.f32 %v1605_v57, %v1477_v45  ;;  %1515 = vmatmul.bf16.gmra.mxu0 %v3381_v15  ;;  %v3392_v45 = vld [vmem:[#allocation67_spill] sm:$0xff] }
 0x408   :  { %v1607_v34 = vpop.f32.mrf.mxu1 }
 0x409   :  { %1726 = vst.msk [vmem:[%s3208_s5] sm:$0xff] %vm1725_vm0, %v1606_v51 }
 0x40c   :  { %v1478_v30 = vpop.f32.mrf.mxu0 }
 0x40d   :  { %v1479_v16 = vadd.f32 %v1478_v30, %v1350_v17  ;;  %v1382_v30 = vpop.f32.mrf.mxu3 }
 0x40e   :  { %v1383_v22 = vadd.f32 %v1382_v30, %v2919_v36  ;;  %v3405_v30 = vld [vmem:[#allocation18_spill] sm:$0xff] }
 0x40f   :  { %v1608_v41 = vadd.f32 %v1607_v34, %v1479_v16  ;;  %v1370_v16 = vadd.f32 %v1369_v46, %v2919_v36 }
 0x410   :  { %v1610_v23 = vpop.f32.mrf.mxu1 }
 0x411   :  { %1727 = vst.msk [vmem:[%s3208_s5 + $0x8] sm:$0xff] %vm1725_vm0, %v1608_v41 }
 0x413   :  { %1649 = vmatmul.bf16.gmra.mxu1 %v3383_v59 }
 0x414   :  { %v1481_v33 = vpop.f32.mrf.mxu0 }
 0x415   :  { %v1482_v18 = vadd.f32 %v1481_v33, %v1353_v55  ;;  %v1384_v59 = vpop.f32.mrf.mxu3  ;;  %v3394_v33 = vld [vmem:[#allocation23_spill] sm:$0xff] }
 0x416   :  { %1441 = vmatmul.bf16.gmra.mxu3 %v3394_v33 }
 0x417   :  { %v1611_v39 = vadd.f32 %v1610_v23, %v1482_v18  ;;  %1520 = vmatmul.bf16.gmra.mxu0 %v3384_v40  ;;  %v3395_v18 = vld [vmem:[#allocation68_spill] sm:$0xff] }
 0x418   :  { %v1612_v52 = vpop.f32.mrf.mxu1 }
 0x419   :  { %1728 = vst.msk [vmem:[%s3208_s5 + $0x10] sm:$0xff] %vm1725_vm0, %v1611_v39 }
 0x41c   :  { %v1483_v48 = vpop.f32.mrf.mxu0 }
 0x41d   :  { %v1484_v12 = vadd.f32 %v1483_v48, %v1355_v19  ;;  %v1387_v48 = vpop.f32.mrf.mxu3 }
 0x41e   :  { %v1388_v53 = vadd.f32 %v1387_v48, %v2919_v36  ;;  %v3408_v48 = vld [vmem:[#allocation20_spill] sm:$0xff] }
 0x41f   :  { %v1613_v37 = vadd.f32 %v1612_v52, %v1484_v12  ;;  %v1375_v12 = vadd.f32 %v1374_v9, %v2919_v36 }
 0x420   :  { %v1615_v28 = vpop.f32.mrf.mxu1 }
 0x421   :  { %1729 = vst.msk [vmem:[%s3208_s5 + $0x18] sm:$0xff] %vm1725_vm0, %v1613_v37 }
 0x423   :  { %1654 = vmatmul.bf16.gmra.mxu1 %v3386_v1 }
 0x424   :  { %v1486_v27 = vpop.f32.mrf.mxu0 }
 0x425   :  { %v1487_v3 = vadd.f32 %v1486_v27, %v1358_v5  ;;  %v1389_v1 = vpop.f32.mrf.mxu3  ;;  %v3397_v27 = vld [vmem:[#allocation25_spill] sm:$0xff] }
 0x426   :  { %1446 = vmatmul.bf16.gmra.mxu3 %v3397_v27 }
 0x427   :  { %v1616_v21 = vadd.f32 %v1615_v28, %v1487_v3  ;;  %1525 = vmatmul.bf16.gmra.mxu0 %v3387_v10  ;;  %v3398_v3 = vld [vmem:[#allocation69_spill] sm:$0xff] }
 0x428   :  { %v1617_v47 = vpop.f32.mrf.mxu1 }
 0x429   :  { %1730 = vst.msk [vmem:[%s3208_s5 + $0x20] sm:$0xff] %vm1725_vm0, %v1616_v21 }
 0x42c   :  { %v1488_v49 = vpop.f32.mrf.mxu0 }
 0x42d   :  { %v1489_v20 = vadd.f32 %v1488_v49, %v1360_v14  ;;  %v1392_v49 = vpop.f32.mrf.mxu3 }
 0x42e   :  { %v1393_v33 = vadd.f32 %v1392_v49, %v2919_v36 }
 0x42f   :  { %v1618_v60 = vadd.f32 %v1617_v47, %v1489_v20  ;;  %v1380_v20 = vadd.f32 %v1379_v25, %v2919_v36 }
 0x430   :  { %v1620_v54 = vpop.f32.mrf.mxu1 }
 0x431   :  { %1731 = vst.msk [vmem:[%s3208_s5 + $0x28] sm:$0xff] %vm1725_vm0, %v1618_v60 }
 0x433   :  { %1659 = vmatmul.bf16.gmra.mxu1 %v3389_v0 }
 0x434   :  { %v1491_v50 = vpop.f32.mrf.mxu0 }
 0x435   :  { %v1492_v4 = vadd.f32 %v1491_v50, %v1363_v32  ;;  %v1394_v0 = vpop.f32.mrf.mxu3  ;;  %v3400_v50 = vld [vmem:[#allocation27_spill] sm:$0xff] }
 0x436   :  { %1451 = vmatmul.bf16.gmra.mxu3 %v3400_v50 }
 0x437   :  { %v1621_v6 = vadd.f32 %v1620_v54, %v1492_v4  ;;  %1530 = vmatmul.bf16.gmra.mxu0 %v3390_v26  ;;  %v3401_v4 = vld [vmem:[#allocation72_spill] sm:$0xff] }
 0x438   :  { %v1622_v13 = vpop.f32.mrf.mxu1 }
 0x439   :  { %1732 = vst.msk [vmem:[%s3208_s5 + $0x30] sm:$0xff] %vm1725_vm0, %v1621_v6 }
 0x43c   :  { %v1493_v61 = vpop.f32.mrf.mxu0 }
 0x43d   :  { %v1494_v57 = vadd.f32 %v1493_v61, %v1365_v29  ;;  %v1397_v61 = vpop.f32.mrf.mxu3 }
 0x43e   :  { %v1398_v27 = vadd.f32 %v1397_v61, %v2919_v36 }
 0x43f   :  { %v1623_v62 = vadd.f32 %v1622_v13, %v1494_v57  ;;  %v1385_v57 = vadd.f32 %v1384_v59, %v2919_v36 }
 0x440   :  { %v1625_v58 = vpop.f32.mrf.mxu1 }
 0x441   :  { %1733 = vst.msk [vmem:[%s3208_s5 + $0x38] sm:$0xff] %vm1725_vm0, %v1623_v62 }
 0x443   :  { %1664 = vmatmul.bf16.gmra.mxu1 %v3392_v45 }
 0x444   :  { %v1496_v51 = vpop.f32.mrf.mxu0 }
 0x445   :  { %v1497_v15 = vadd.f32 %v1496_v51, %v1368_v42  ;;  %v1399_v45 = vpop.f32.mrf.mxu3  ;;  %v3403_v51 = vld [vmem:[#allocation29_spill] sm:$0xff] }
 0x446   :  { %1456 = vmatmul.bf16.gmra.mxu3 %v3403_v51 }
 0x447   :  { %v1626_v34 = vadd.f32 %v1625_v58, %v1497_v15  ;;  %1535 = vmatmul.bf16.gmra.mxu0 %v3393_v38  ;;  %v3404_v15 = vld [vmem:[#allocation74_spill] sm:$0xff] }
 0x448   :  { %v1627_v17 = vpop.f32.mrf.mxu1 }
 0x449   :  { %1734 = vst.msk [vmem:[%s3208_s5 + $0x40] sm:$0xff] %vm1725_vm0, %v1626_v34 }
 0x44c   :  { %v1498_v41 = vpop.f32.mrf.mxu0 }
 0x44d   :  { %v1499_v23 = vadd.f32 %v1498_v41, %v1370_v16  ;;  %v1402_v41 = vpop.f32.mrf.mxu3 }
 0x44f   :  { %v1628_v55 = vadd.f32 %v1627_v17, %v1499_v23  ;;  %v1390_v23 = vadd.f32 %v1389_v1, %v2919_v36 }
 0x450   :  { %v1630_v63 = vpop.f32.mrf.mxu1 }
 0x451   :  { %1735 = vst.msk [vmem:[%s3208_s5 + $0x48] sm:$0xff] %vm1725_vm0, %v1628_v55 }
 0x453   :  { %1669 = vmatmul.bf16.gmra.mxu1 %v3395_v18 }
 0x454   :  { %v1501_v39 = vpop.f32.mrf.mxu0 }
 0x455   :  { %v1502_v40 = vadd.f32 %v1501_v39, %v1373_v35  ;;  %v1404_v18 = vpop.f32.mrf.mxu3  ;;  %v3406_v39 = vld [vmem:[#allocation32_spill] sm:$0xff] }
 0x456   :  { %1461 = vmatmul.bf16.gmra.mxu3 %v3406_v39  ;;  %v1405_v61 = vadd.f32 %v1404_v18, %v2919_v36 }
 0x457   :  { %v1631_v52 = vadd.f32 %v1630_v63, %v1502_v40  ;;  %1540 = vmatmul.bf16.gmra.mxu0 %v3396_v2  ;;  %v3407_v40 = vld [vmem:[#allocation77_spill] sm:$0xff] }
 0x458   :  { %v1632_v19 = vpop.f32.mrf.mxu1 }
 0x459   :  { %1736 = vst.msk [vmem:[%s3208_s5 + $0x50] sm:$0xff] %vm1725_vm0, %v1631_v52 }
 0x45c   :  { %v1503_v37 = vpop.f32.mrf.mxu0 }
 0x45d   :  { %v1504_v28 = vadd.f32 %v1503_v37, %v1375_v12  ;;  %v1407_v37 = vpop.f32.mrf.mxu3 }
 0x45f   :  { %v1633_v5 = vadd.f32 %v1632_v19, %v1504_v28  ;;  %v1395_v28 = vadd.f32 %v1394_v0, %v2919_v36  ;;  %v1403_v0 = vadd.f32 %v1402_v41, %v2919_v36 }
 0x460   :  { %v1635_v46 = vpop.f32.mrf.mxu1 }
 0x461   :  { %1737 = vst.msk [vmem:[%s3208_s5 + $0x58] sm:$0xff] %vm1725_vm0, %v1633_v5 }
 0x463   :  { %1674 = vmatmul.bf16.gmra.mxu1 %v3398_v3 }
 0x464   :  { %v1506_v21 = vpop.f32.mrf.mxu0 }
 0x465   :  { %v1507_v10 = vadd.f32 %v1506_v21, %v1378_v43  ;;  %v1409_v3 = vpop.f32.mrf.mxu3  ;;  %v3409_v21 = vld [vmem:[#allocation79_spill] sm:$0xff] }
 0x467   :  { %v1636_v47 = vadd.f32 %v1635_v46, %v1507_v10  ;;  %1545 = vmatmul.bf16.gmra.mxu0 %v3399_v8 }
 0x468   :  { %v1637_v14 = vpop.f32.mrf.mxu1 }
 0x469   :  { %1738 = vst.msk [vmem:[%s3208_s5 + $0x60] sm:$0xff] %vm1725_vm0, %v1636_v47 }
 0x46c   :  { %v1508_v60 = vpop.f32.mrf.mxu0 }
 0x46d   :  { %v1509_v54 = vadd.f32 %v1508_v60, %v1380_v20  ;;  %v1412_v20 = vpop.f32.mrf.mxu3  ;;  %v1400_v60 = vadd.f32 %v1399_v45, %v2919_v36 }
 0x46f   :  { %v1638_v32 = vadd.f32 %v1637_v14, %v1509_v54  ;;  %v3410_v14 = vld [vmem:[#allocation22_spill] sm:$0xff] }
 0x470   :  { %v1640_v9 = vpop.f32.mrf.mxu1 }
 0x471   :  { %1739 = vst.msk [vmem:[%s3208_s5 + $0x68] sm:$0xff] %vm1725_vm0, %v1638_v32 }
 0x473   :  { %1679 = vmatmul.bf16.gmra.mxu1 %v3401_v4 }
 0x474   :  { %v1511_v6 = vpop.f32.mrf.mxu0 }
 0x475   :  { %v1512_v26 = vadd.f32 %v1511_v6, %v1383_v22  ;;  %v1414_v50 = vpop.f32.mrf.mxu3 }
 0x476   :  { %v1415_v39 = vadd.f32 %v1414_v50, %v2919_v36 }
 0x477   :  { %v1641_v13 = vadd.f32 %v1640_v9, %v1512_v26  ;;  %1550 = vmatmul.bf16.gmra.mxu0 %v3402_v31 }
 0x478   :  { %v1642_v29 = vpop.f32.mrf.mxu1 }
 0x479   :  { %1740 = vst.msk [vmem:[%s3208_s5 + $0x70] sm:$0xff] %vm1725_vm0, %v1641_v13  ;;  %v3411_v13 = vld [vmem:[#allocation24_spill] sm:$0xff] }
 0x47c   :  { %v1513_v62 = vpop.f32.mrf.mxu0 }
 0x47d   :  { %v1514_v58 = vadd.f32 %v1513_v62, %v1385_v57 }
 0x47f   :  { %v1643_v42 = vadd.f32 %v1642_v29, %v1514_v58  ;;  %v1417_v29 = vpop.f32.mrf.mxu3 }
 0x480   :  { %v1645_v25 = vpop.f32.mrf.mxu1 }
 0x481   :  { %1741 = vst.msk [vmem:[%s3208_s5 + $0x78] sm:$0xff] %vm1725_vm0, %v1643_v42 }
 0x483   :  { %1684 = vmatmul.bf16.gmra.mxu1 %v3404_v15  ;;  %v3412_v15 = vld [vmem:[#allocation26_spill] sm:$0xff] }
 0x484   :  { %v1516_v34 = vpop.f32.mrf.mxu0 }
 0x485   :  { %v1517_v38 = vadd.f32 %v1516_v34, %v1388_v53 }
 0x487   :  { %v1646_v17 = vadd.f32 %v1645_v25, %v1517_v38  ;;  %1555 = vmatmul.bf16.gmra.mxu0 %v3405_v30  ;;  %v1419_v53 = vpop.f32.mrf.mxu3  ;;  %v1410_v38 = vadd.f32 %v1409_v3, %v2919_v36 }
 0x488   :  { %v1647_v16 = vpop.f32.mrf.mxu1 }
 0x489   :  { %1742 = vst.msk [vmem:[%s3208_s5 + $0x80] sm:$0xff] %vm1725_vm0, %v1646_v17 }
 0x48c   :  { %v1518_v55 = vpop.f32.mrf.mxu0 }
 0x48d   :  { %v1519_v63 = vadd.f32 %v1518_v55, %v1390_v23 }
 0x48f   :  { %v1648_v35 = vadd.f32 %v1647_v16, %v1519_v63  ;;  %v1422_v16 = vpop.f32.mrf.mxu3 }
 0x490   :  { %v1650_v59 = vpop.f32.mrf.mxu1 }
 0x491   :  { %1743 = vst.msk [vmem:[%s3208_s5 + $0x88] sm:$0xff] %vm1725_vm0, %v1648_v35 }
 0x493   :  { %1689 = vmatmul.bf16.gmra.mxu1 %v3407_v40 }
 0x494   :  { %v1521_v52 = vpop.f32.mrf.mxu0 }
 0x495   :  { %v1522_v2 = vadd.f32 %v1521_v52, %v1393_v33 }
 0x497   :  { %v1651_v19 = vadd.f32 %v1650_v59, %v1522_v2  ;;  %1560 = vmatmul.bf16.gmra.mxu0 %v3408_v48  ;;  %v3413_v59 = vld [vmem:[#allocation28_spill] sm:$0xff]  ;;  %v1424_v18 = vpop.f32.mrf.mxu3 }
 0x498   :  { %v1652_v12 = vpop.f32.mrf.mxu1 }
 0x499   :  { %1744 = vst.msk [vmem:[%s3208_s5 + $0x90] sm:$0xff] %vm1725_vm0, %v1651_v19 }
 0x49c   :  { %v1523_v5 = vpop.f32.mrf.mxu0 }
 0x49d   :  { %v1524_v46 = vadd.f32 %v1523_v5, %v1395_v28  ;;  %v3414_v5 = vld [vmem:[#allocation30_spill] sm:$0xff] }
 0x49f   :  { %v1653_v43 = vadd.f32 %v1652_v12, %v1524_v46  ;;  %v1427_v48 = vpop.f32.mrf.mxu3 }
 0x4a0   :  { %v1655_v1 = vpop.f32.mrf.mxu1 }
 0x4a1   :  { %1745 = vst.msk [vmem:[%s3208_s5 + $0x98] sm:$0xff] %vm1725_vm0, %v1653_v43  ;;  %v1420_v43 = vadd.f32 %v1419_v53, %v2919_v36 }
 0x4a3   :  { %1694 = vmatmul.bf16.gmra.mxu1 %v3409_v21 }
 0x4a4   :  { %v1526_v10 = vpop.f32.mrf.mxu0 }
 0x4a5   :  { %v1527_v47 = vadd.f32 %v1526_v10, %v1398_v27 }
 0x4a7   :  { %v1656_v8 = vadd.f32 %v1655_v1, %v1527_v47  ;;  %1565 = vmatmul.bf16.gmra.mxu0 %v3410_v14  ;;  %v1429_v27 = vpop.f32.mrf.mxu3 }
 0x4a8   :  { %v1657_v49 = vpop.f32.mrf.mxu1 }
 0x4a9   :  { %1746 = vst.msk [vmem:[%s3208_s5 + $0xa0] sm:$0xff] %vm1725_vm0, %v1656_v8 }
 0x4ac   :  { %v1528_v54 = vpop.f32.mrf.mxu0 }
 0x4ad   :  { %v1529_v32 = vadd.f32 %v1528_v54, %v1400_v60  ;;  %v1425_v54 = vadd.f32 %v1424_v18, %v2919_v36 }
 0x4af   :  { %v1658_v9 = vadd.f32 %v1657_v49, %v1529_v32  ;;  %v1432_v14 = vpop.f32.mrf.mxu3 }
 0x4b0   :  { %v1660_v22 = vpop.f32.mrf.mxu1 }
 0x4b1   :  { %1747 = vst.msk [vmem:[%s3208_s5 + $0xa8] sm:$0xff] %vm1725_vm0, %v1658_v9 }
 0x4b3   :  { %1699 = vmatmul.bf16.gmra.mxu1 %v2728_v11  ;;  %v1408_v11 = vadd.f32 %v1407_v37, %v2919_v36 }
 0x4b4   :  { %v1531_v4 = vpop.f32.mrf.mxu0 }
 0x4b5   :  { %v1532_v6 = vadd.f32 %v1531_v4, %v1403_v0 }
 0x4b7   :  { %v1661_v26 = vadd.f32 %v1660_v22, %v1532_v6  ;;  %1570 = vmatmul.bf16.gmra.mxu0 %v3411_v13  ;;  %v1434_v50 = vpop.f32.mrf.mxu3 }
 0x4b8   :  { %v1662_v31 = vpop.f32.mrf.mxu1 }
 0x4b9   :  { %1748 = vst.msk [vmem:[%s3208_s5 + $0xb0] sm:$0xff] %vm1725_vm0, %v1661_v26 }
 0x4bc   :  { %v1533_v57 = vpop.f32.mrf.mxu0 }
 0x4bd   :  { %v1534_v62 = vadd.f32 %v1533_v57, %v1405_v61 }
 0x4bf   :  { %v1663_v58 = vadd.f32 %v1662_v31, %v1534_v62  ;;  %v1437_v31 = vpop.f32.mrf.mxu3 }
 0x4c0   :  { %v1665_v42 = vpop.f32.mrf.mxu1 }
 0x4c1   :  { %1749 = vst.msk [vmem:[%s3208_s5 + $0xb8] sm:$0xff] %vm1725_vm0, %v1663_v58 }
 0x4c3   :  { %1704 = vmatmul.bf16.gmra.mxu1 %v2733_v44  ;;  %v1413_v44 = vadd.f32 %v1412_v20, %v2919_v36  ;;  %v3415_v20 = vld [vmem:[#allocation33_spill] sm:$0xff] }
 0x4c4   :  { %v1536_v25 = vpop.f32.mrf.mxu0 }
 0x4c5   :  { %v1537_v45 = vadd.f32 %v1536_v25, %v1408_v11 }
 0x4c7   :  { %v1666_v51 = vadd.f32 %v1665_v42, %v1537_v45  ;;  %1575 = vmatmul.bf16.gmra.mxu0 %v3412_v15  ;;  %v1433_v42 = vadd.f32 %v1432_v14, %v2919_v36  ;;  %v1439_v25 = vpop.f32.mrf.mxu3  ;;  %v1435_v15 = vadd.f32 %v1434_v50, %v2919_v36 }
 0x4c8   :  { %v1667_v34 = vpop.f32.mrf.mxu1 }
 0x4c9   :  { %1750 = vst.msk [vmem:[%s3208_s5 + $0xc0] sm:$0xff] %vm1725_vm0, %v1666_v51 }
 0x4cc   :  { %v1538_v17 = vpop.f32.mrf.mxu0 }
 0x4cd   :  { %v1539_v30 = vadd.f32 %v1538_v17, %v1410_v38 }
 0x4cf   :  { %v1668_v41 = vadd.f32 %v1667_v34, %v1539_v30  ;;  %v1442_v17 = vpop.f32.mrf.mxu3 }
 0x4d0   :  { %v1670_v23 = vpop.f32.mrf.mxu1 }
 0x4d1   :  { %1751 = vst.msk [vmem:[%s3208_s5 + $0xc8] sm:$0xff] %vm1725_vm0, %v1668_v41  ;;  %v1438_v41 = vadd.f32 %v1437_v31, %v2919_v36 }
 0x4d3   :  { %1709 = vmatmul.bf16.gmra.mxu1 %v2744_v56  ;;  %v1418_v56 = vadd.f32 %v1417_v29, %v2919_v36  ;;  %v1430_v29 = vadd.f32 %v1429_v27, %v2919_v36 }
 0x4d4   :  { %v1541_v55 = vpop.f32.mrf.mxu0 }
 0x4d5   :  { %v1542_v63 = vadd.f32 %v1541_v55, %v1413_v44 }
 0x4d7   :  { %v1671_v35 = vadd.f32 %v1670_v23, %v1542_v63  ;;  %1580 = vmatmul.bf16.gmra.mxu0 %v3413_v59  ;;  %v1440_v59 = vadd.f32 %v1439_v25, %v2919_v36 }
 0x4d8   :  { %v1672_v33 = vpop.f32.mrf.mxu1 }
 0x4d9   :  { %1752 = vst.msk [vmem:[%s3208_s5 + $0xd0] sm:$0xff] %vm1725_vm0, %v1671_v35  ;;  %v1444_v35 = vpop.f32.mrf.mxu3 }
 0x4dc   :  { %v1543_v40 = vpop.f32.mrf.mxu0 }
 0x4dd   :  { %v1544_v52 = vadd.f32 %v1543_v40, %v1415_v39 }
 0x4df   :  { %v1673_v2 = vadd.f32 %v1672_v33, %v1544_v52  ;;  %v1443_v52 = vadd.f32 %v1442_v17, %v2919_v36 }
 0x4e0   :  { %v1675_v19 = vpop.f32.mrf.mxu1 }
 0x4e1   :  { %1753 = vst.msk [vmem:[%s3208_s5 + $0xd8] sm:$0xff] %vm1725_vm0, %v1673_v2  ;;  %v1447_v2 = vpop.f32.mrf.mxu3 }
 0x4e2   :  { %v1448_v27 = vadd.f32 %v1447_v2, %v2919_v36 }
 0x4e3   :  { %1714 = vmatmul.bf16.gmra.mxu1 %v2763_v7  ;;  %v1423_v7 = vadd.f32 %v1422_v16, %v2919_v36 }
 0x4e4   :  { %v1546_v12 = vpop.f32.mrf.mxu0 }
 0x4e5   :  { %v1547_v37 = vadd.f32 %v1546_v12, %v1418_v56 }
 0x4e7   :  { %v1676_v28 = vadd.f32 %v1675_v19, %v1547_v37  ;;  %1585 = vmatmul.bf16.gmra.mxu0 %v3414_v5  ;;  %v1445_v37 = vadd.f32 %v1444_v35, %v2919_v36 }
 0x4e8   :  { %v1677_v46 = vpop.f32.mrf.mxu1 }
 0x4e9   :  { %1754 = vst.msk [vmem:[%s3208_s5 + $0xe0] sm:$0xff] %vm1725_vm0, %v1676_v28  ;;  %v1449_v5 = vpop.f32.mrf.mxu3 }
 0x4ec   :  { %v1548_v1 = vpop.f32.mrf.mxu0 }
 0x4ed   :  { %v1549_v3 = vadd.f32 %v1548_v1, %v1420_v43 }
 0x4ef   :  { %v1678_v21 = vadd.f32 %v1677_v46, %v1549_v3 }
 0x4f0   :  { %v1680_v10 = vpop.f32.mrf.mxu1 }
 0x4f1   :  { %1755 = vst.msk [vmem:[%s3208_s5 + $0xe8] sm:$0xff] %vm1725_vm0, %v1678_v21 }
 0x4f3   :  { %1719 = vmatmul.bf16.gmra.mxu1 %v2774_v24  ;;  %v1428_v24 = vadd.f32 %v1427_v48, %v2919_v36 }
 0x4f4   :  { %v1551_v47 = vpop.f32.mrf.mxu0 }
 0x4f5   :  { %v1552_v8 = vadd.f32 %v1551_v47, %v1423_v7 }
 0x4f7   :  { %v1681_v49 = vadd.f32 %v1680_v10, %v1552_v8  ;;  %1590 = vmatmul.bf16.gmra.mxu0 %v3415_v20  ;;  %v1452_v10 = vpop.f32.mrf.mxu3  ;;  %v1450_v8 = vadd.f32 %v1449_v5, %v2919_v36 }
 0x4f8   :  { %v1682_v60 = vpop.f32.mrf.mxu1 }
 0x4f9   :  { %1756 = vst.msk [vmem:[%s3208_s5 + $0xf0] sm:$0xff] %vm1725_vm0, %v1681_v49 }
 0x4fc   :  { %v1553_v32 = vpop.f32.mrf.mxu0 }
 0x4fd   :  { %v1554_v9 = vadd.f32 %v1553_v32, %v1425_v54  ;;  %v1453_v32 = vadd.f32 %v1452_v10, %v2919_v36 }
 0x4ff   :  { %v1683_v22 = vadd.f32 %v1682_v60, %v1554_v9  ;;  %v1454_v54 = vpop.f32.mrf.mxu3 }
 0x500   :  { %v1685_v0 = vpop.f32.mrf.mxu1 }
 0x501   :  { %1757 = vst.msk [vmem:[%s3208_s5 + $0xf8] sm:$0xff] %vm1725_vm0, %v1683_v22 }
 0x504   :  { %v1556_v4 = vpop.f32.mrf.mxu0 }
 0x505   :  { %v1557_v6 = vadd.f32 %v1556_v4, %v1428_v24  ;;  %v1455_v4 = vadd.f32 %v1454_v54, %v2919_v36 }
 0x507   :  { %v1686_v26 = vadd.f32 %v1685_v0, %v1557_v6  ;;  %v1457_v24 = vpop.f32.mrf.mxu3 }
 0x508   :  { %v1687_v13 = vpop.f32.mrf.mxu1 }
 0x509   :  { %1758 = vst.msk [vmem:[%s3208_s5 + $0x100] sm:$0xff] %vm1725_vm0, %v1686_v26 }
 0x50c   :  { %v1558_v61 = vpop.f32.mrf.mxu0 }
 0x50d   :  { %v1559_v57 = vadd.f32 %v1558_v61, %v1430_v29  ;;  %v1458_v29 = vadd.f32 %v1457_v24, %v2919_v36 }
 0x50f   :  { %v1688_v62 = vadd.f32 %v1687_v13, %v1559_v57  ;;  %v1459_v57 = vpop.f32.mrf.mxu3 }
 0x510   :  { %v1690_v58 = vpop.f32.mrf.mxu1 }
 0x511   :  { %1759 = vst.msk [vmem:[%s3208_s5 + $0x108] sm:$0xff] %vm1725_vm0, %v1688_v62 }
 0x514   :  { %v1561_v11 = vpop.f32.mrf.mxu0 }
 0x515   :  { %v1562_v53 = vadd.f32 %v1561_v11, %v1433_v42  ;;  %v1460_v11 = vadd.f32 %v1459_v57, %v2919_v36 }
 0x517   :  { %v1691_v45 = vadd.f32 %v1690_v58, %v1562_v53 }
 0x518   :  { %v1692_v51 = vpop.f32.mrf.mxu1 }
 0x519   :  { %1760 = vst.msk [vmem:[%s3208_s5 + $0x110] sm:$0xff] %vm1725_vm0, %v1691_v45  ;;  %v1462_v45 = vpop.f32.mrf.mxu3 }
 0x51c   :  { %v1563_v34 = vpop.f32.mrf.mxu0 }
 0x51d   :  { %v1564_v38 = vadd.f32 %v1563_v34, %v1435_v15  ;;  %v1463_v15 = vadd.f32 %v1462_v45, %v2919_v36 }
 0x51f   :  { %v1693_v30 = vadd.f32 %v1692_v51, %v1564_v38 }
 0x520   :  { %v1695_v16 = vpop.f32.mrf.mxu1 }
 0x521   :  { %1761 = vst.msk [vmem:[%s3208_s5 + $0x118] sm:$0xff] %vm1725_vm0, %v1693_v30 }
 0x524   :  { %v1566_v23 = vpop.f32.mrf.mxu0 }
 0x525   :  { %v1567_v44 = vadd.f32 %v1566_v23, %v1438_v41 }
 0x527   :  { %v1696_v55 = vadd.f32 %v1695_v16, %v1567_v44  ;;  %v1464_v16 = vpop.f32.mrf.mxu3 }
 0x528   :  { %v1697_v63 = vpop.f32.mrf.mxu1  ;;  %v1465_v41 = vadd.f32 %v1464_v16, %v2919_v36 }
 0x529   :  { %1762 = vst.msk [vmem:[%s3208_s5 + $0x120] sm:$0xff] %vm1725_vm0, %v1696_v55 }
 0x52c   :  { %v1568_v33 = vpop.f32.mrf.mxu0 }
 0x52d   :  { %v1569_v18 = vadd.f32 %v1568_v33, %v1440_v59 }
 0x52f   :  { %v1698_v39 = vadd.f32 %v1697_v63, %v1569_v18 }
 0x530   :  { %v1700_v40 = vpop.f32.mrf.mxu1 }
 0x531   :  { %1763 = vst.msk [vmem:[%s3208_s5 + $0x128] sm:$0xff] %vm1725_vm0, %v1698_v39 }
 0x534   :  { %v1571_v19 = vpop.f32.mrf.mxu0 }
 0x535   :  { %v1572_v56 = vadd.f32 %v1571_v19, %v1443_v52 }
 0x537   :  { %v1701_v48 = vadd.f32 %v1700_v40, %v1572_v56 }
 0x538   :  { %v1702_v12 = vpop.f32.mrf.mxu1 }
 0x539   :  { %1764 = vst.msk [vmem:[%s3208_s5 + $0x130] sm:$0xff] %vm1725_vm0, %v1701_v48 }
 0x53c   :  { %v1573_v28 = vpop.f32.mrf.mxu0 }
 0x53d   :  { %v1574_v46 = vadd.f32 %v1573_v28, %v1445_v37 }
 0x53f   :  { %v1703_v43 = vadd.f32 %v1702_v12, %v1574_v46 }
 0x540   :  { %v1705_v1 = vpop.f32.mrf.mxu1 }
 0x541   :  { %1765 = vst.msk [vmem:[%s3208_s5 + $0x138] sm:$0xff] %vm1725_vm0, %v1703_v43 }
 0x544   :  { %v1576_v3 = vpop.f32.mrf.mxu0 }
 0x545   :  { %v1577_v21 = vadd.f32 %v1576_v3, %v1448_v27 }
 0x547   :  { %v1706_v7 = vadd.f32 %v1705_v1, %v1577_v21 }
 0x548   :  { %v1707_v47 = vpop.f32.mrf.mxu1 }
 0x549   :  { %1766 = vst.msk [vmem:[%s3208_s5 + $0x140] sm:$0xff] %vm1725_vm0, %v1706_v7 }
 0x54c   :  { %v1578_v14 = vpop.f32.mrf.mxu0 }
 0x54d   :  { %v1579_v49 = vadd.f32 %v1578_v14, %v1450_v8 }
 0x54f   :  { %v1708_v20 = vadd.f32 %v1707_v47, %v1579_v49 }
 0x550   :  { %v1710_v60 = vpop.f32.mrf.mxu1 }
 0x551   :  { %1767 = vst.msk [vmem:[%s3208_s5 + $0x148] sm:$0xff] %vm1725_vm0, %v1708_v20 }
 0x554   :  { %v1581_v9 = vpop.f32.mrf.mxu0 }
 0x555   :  { %v1582_v22 = vadd.f32 %v1581_v9, %v1453_v32 }
 0x557   :  { %v1711_v0 = vadd.f32 %v1710_v60, %v1582_v22 }
 0x558   :  { %v1712_v50 = vpop.f32.mrf.mxu1 }
 0x559   :  { %1768 = vst.msk [vmem:[%s3208_s5 + $0x150] sm:$0xff] %vm1725_vm0, %v1711_v0 }
 0x55c   :  { %v1583_v6 = vpop.f32.mrf.mxu0 }
 0x55d   :  { %v1584_v26 = vadd.f32 %v1583_v6, %v1455_v4 }
 0x55f   :  { %v1713_v13 = vadd.f32 %v1712_v50, %v1584_v26 }
 0x560   :  { %v1715_v31 = vpop.f32.mrf.mxu1 }
 0x561   :  { %1769 = vst.msk [vmem:[%s3208_s5 + $0x158] sm:$0xff] %vm1725_vm0, %v1713_v13 }
 0x564   :  { %v1586_v61 = vpop.f32.mrf.mxu0 }
 0x565   :  { %v1587_v62 = vadd.f32 %v1586_v61, %v1458_v29 }
 0x567   :  { %v1716_v58 = vadd.f32 %v1715_v31, %v1587_v62 }
 0x568   :  { %v1717_v42 = vpop.f32.mrf.mxu1 }
 0x569   :  { %1770 = vst.msk [vmem:[%s3208_s5 + $0x160] sm:$0xff] %vm1725_vm0, %v1716_v58 }
 0x56c   :  { %v1588_v25 = vpop.f32.mrf.mxu0 }
 0x56d   :  { %v1589_v53 = vadd.f32 %v1588_v25, %v1460_v11 }
 0x56f   :  { %v1718_v51 = vadd.f32 %v1717_v42, %v1589_v53 }
 0x570   :  { %v1720_v38 = vpop.f32.mrf.mxu1 }
 0x571   :  { %1771 = vst.msk [vmem:[%s3208_s5 + $0x168] sm:$0xff] %vm1725_vm0, %v1718_v51 }
 0x574   :  { %v1591_v34 = vpop.f32.mrf.mxu0 }
 0x575   :  { %v1592_v17 = vadd.f32 %v1591_v34, %v1463_v15 }
 0x577   :  { %v1721_v30 = vadd.f32 %v1720_v38, %v1592_v17 }
 0x578   :  { %v1722_v55 = vpop.f32.mrf.mxu1 }
 0x579   :  { %1772 = vst.msk [vmem:[%s3208_s5 + $0x170] sm:$0xff] %vm1725_vm0, %v1721_v30 }
 0x57c   :  { %v1593_v23 = vpop.f32.mrf.mxu0 }
 0x57d   :  { %v1594_v44 = vadd.f32 %v1593_v23, %v1465_v41 }
 0x57f   :  { %v1723_v63 = vadd.f32 %v1722_v55, %v1594_v44 }
 0x581   :  { %1773 = vst.msk [vmem:[%s3208_s5 + $0x178] sm:$0xff] %vm1725_vm0, %v1723_v63 }
 0x582   :  { %1778 = vsyncpa [#allocation4], 1 }
 0x583   :  { %1779 = vsyncpa [#allocation6], 1 }

</bundles_post_ra>
